<compile_context>
chip_gen: v7x
topology: tpu7x:2x2x1
jax: 0.10.0
libtpu: 0.0.40
codegen_flags: <defaults>
</compile_context>

<pallas_src>
import functools

import jax
import jax.numpy as jnp
from jax.experimental import pallas as pl
from jax.experimental.pallas import tpu as pltpu


def _round_up(x, m):
    return ((x + m - 1) // m) * m


def _regression_transform_kernel(anchors_ref, bbox_ref, ldm_ref,
                                 boxes_out_ref, ldm_out_ref,
                                 *, img_w, img_h):
    # Blocks: anchors/bbox -> [1, 4, TN], ldm -> [1, 136, TN].
    a = anchors_ref[0].astype(jnp.float32)   # [4, TN]  (x1, y1, x2, y2)
    d = bbox_ref[0].astype(jnp.float32)      # [4, TN]  (dx, dy, dw, dh)
    l = ldm_ref[0].astype(jnp.float32)       # [136, TN]

    x1 = a[0:1]
    y1 = a[1:2]
    x2 = a[2:3]
    y2 = a[3:4]
    widths = x2 - x1                          # [1, TN]
    heights = y2 - y1
    ctr_x = x1 + 0.5 * widths
    ctr_y = y1 + 0.5 * heights

    # std_box = [0.1, 0.1, 0.2, 0.2]
    dx = d[0:1] * 0.1
    dy = d[1:2] * 0.1
    dw = d[2:3] * 0.2
    dh = d[3:4] * 0.2

    pred_ctr_x = ctr_x + dx * widths
    pred_ctr_y = ctr_y + dy * heights
    pred_w = jnp.exp(dw) * widths
    pred_h = jnp.exp(dh) * heights

    w_f = jnp.float32(img_w)
    h_f = jnp.float32(img_h)

    bx1 = jnp.clip(pred_ctr_x - 0.5 * pred_w, 0.0, w_f)
    by1 = jnp.clip(pred_ctr_y - 0.5 * pred_h, 0.0, h_f)
    bx2 = jnp.clip(pred_ctr_x + 0.5 * pred_w, 0.0, w_f)
    by2 = jnp.clip(pred_ctr_y + 0.5 * pred_h, 0.0, h_f)

    boxes_out_ref[0, 0:1, :] = bx1.astype(boxes_out_ref.dtype)
    boxes_out_ref[0, 1:2, :] = by1.astype(boxes_out_ref.dtype)
    boxes_out_ref[0, 2:3, :] = bx2.astype(boxes_out_ref.dtype)
    boxes_out_ref[0, 3:4, :] = by2.astype(boxes_out_ref.dtype)

    # Landmarks: std_ldm = 0.1 everywhere; even rows are x coords, odd are y.
    ldm_shape = l.shape                                        # (136, TN)
    row = jax.lax.broadcasted_iota(jnp.int32, ldm_shape, 0)
    is_x = (row % 2) == 0
    base = jnp.where(is_x,
                     jnp.broadcast_to(ctr_x, ldm_shape),
                     jnp.broadcast_to(ctr_y, ldm_shape))
    scale = jnp.where(is_x,
                      jnp.broadcast_to(widths, ldm_shape),
                      jnp.broadcast_to(heights, ldm_shape))
    cmax = jnp.where(is_x, w_f, h_f)
    ldm_pred = jnp.clip(base + (l * 0.1) * scale, 0.0, cmax)
    ldm_out_ref[0] = ldm_pred.astype(ldm_out_ref.dtype)


def regression_transform(anchors, bbox_deltas, ldm_deltas, img, *, tile_n=2048):
    """Pallas implementation of RegressionTransform.forward.

    anchors:     [B, N, 4]   (x1, y1, x2, y2)
    bbox_deltas: [B, N, 4]
    ldm_deltas:  [B, N, 136]
    img:         [B, C, H, W]  (only H, W are used, statically)
    returns (pred_boxes [B, N, 4], pred_landmarks [B, N, 136]) in float32.
    """
    B, N, _ = anchors.shape
    _, _, H, W = img.shape

    # Transpose so the big anchor axis N lands on the 128-lane axis.
    anchors_t = jnp.transpose(anchors, (0, 2, 1))      # [B, 4, N]
    bbox_t = jnp.transpose(bbox_deltas, (0, 2, 1))     # [B, 4, N]
    ldm_t = jnp.transpose(ldm_deltas, (0, 2, 1))       # [B, 136, N]

    # Large lane tile; pad N so every block is full and 128-lane aligned.
    tn = min(tile_n, _round_up(N, 128))
    n_pad = _round_up(N, tn)
    if n_pad != N:
        pad = [(0, 0), (0, 0), (0, n_pad - N)]
        anchors_t = jnp.pad(anchors_t, pad)
        bbox_t = jnp.pad(bbox_t, pad)
        ldm_t = jnp.pad(ldm_t, pad)

    grid = (B, n_pad // tn)
    kernel = functools.partial(_regression_transform_kernel,
                               img_w=float(W), img_h=float(H))

    boxes_t, ldm_out_t = pl.pallas_call(
        kernel,
        out_shape=(
            jax.ShapeDtypeStruct((B, 4, n_pad), jnp.float32),
            jax.ShapeDtypeStruct((B, 136, n_pad), jnp.float32),
        ),
        grid_spec=pltpu.PrefetchScalarGridSpec(
            num_scalar_prefetch=0,
            grid=grid,
            in_specs=[
                pl.BlockSpec((1, 4, tn), lambda b, n: (b, 0, n)),
                pl.BlockSpec((1, 4, tn), lambda b, n: (b, 0, n)),
                pl.BlockSpec((1, 136, tn), lambda b, n: (b, 0, n)),
            ],
            out_specs=[
                pl.BlockSpec((1, 4, tn), lambda b, n: (b, 0, n)),
                pl.BlockSpec((1, 136, tn), lambda b, n: (b, 0, n)),
            ],
        ),
        compiler_params=pltpu.CompilerParams(
            dimension_semantics=("parallel", "parallel")),
    )(anchors_t, bbox_t, ldm_t)

    pred_boxes = jnp.transpose(boxes_t[:, :, :N], (0, 2, 1))        # [B, N, 4]
    pred_landmarks = jnp.transpose(ldm_out_t[:, :, :N], (0, 2, 1))  # [B, N, 136]
    return pred_boxes, pred_landmarks


def regression_transform_ref(anchors, bbox_deltas, ldm_deltas, img):
    """Pure-JAX reference (matches the PyTorch module)."""
    std_box = jnp.array([0.1, 0.1, 0.2, 0.2], jnp.float32)
    widths = anchors[:, :, 2] - anchors[:, :, 0]
    heights = anchors[:, :, 3] - anchors[:, :, 1]
    ctr_x = anchors[:, :, 0] + 0.5 * widths
    ctr_y = anchors[:, :, 1] + 0.5 * heights

    bb = bbox_deltas * std_box
    dx, dy, dw, dh = bb[:, :, 0], bb[:, :, 1], bb[:, :, 2], bb[:, :, 3]
    pred_ctr_x = ctr_x + dx * widths
    pred_ctr_y = ctr_y + dy * heights
    pred_w = jnp.exp(dw) * widths
    pred_h = jnp.exp(dh) * heights

    x1 = pred_ctr_x - 0.5 * pred_w
    y1 = pred_ctr_y - 0.5 * pred_h
    x2 = pred_ctr_x + 0.5 * pred_w
    y2 = pred_ctr_y + 0.5 * pred_h

    _, _, H, W = img.shape
    boxes = jnp.stack([jnp.clip(x1, 0.0, float(W)),
                       jnp.clip(y1, 0.0, float(H)),
                       jnp.clip(x2, 0.0, float(W)),
                       jnp.clip(y2, 0.0, float(H))], axis=2)

    ldm = ldm_deltas * 0.1
    idx = jnp.arange(136)
    is_x = (idx % 2) == 0
    base = jnp.where(is_x, ctr_x[..., None], ctr_y[..., None])
    scale = jnp.where(is_x, widths[..., None], heights[..., None])
    cmax = jnp.where(is_x, float(W), float(H))
    landmarks = jnp.clip(base + ldm * scale, 0.0, cmax)
    return boxes, landmarks


if __name__ == "__main__":
    key = jax.random.PRNGKey(0)
    k1, k2, k3, k4 = jax.random.split(key, 4)

    # Small shapes consistent with the module: B=2, N=300 anchors, 64x64 image.
    B, N = 2, 300
    H_img, W_img = 64, 64

    xy1 = jax.random.uniform(k1, (B, N, 2), minval=0.0, maxval=48.0,
                             dtype=jnp.float32)
    wh = jax.random.uniform(k2, (B, N, 2), minval=4.0, maxval=16.0,
                            dtype=jnp.float32)
    anchors = jnp.concatenate([xy1, xy1 + wh], axis=-1)            # [B, N, 4]
    bbox_deltas = jax.random.normal(k3, (B, N, 4), dtype=jnp.float32) * 0.5
    ldm_deltas = jax.random.normal(k4, (B, N, 136), dtype=jnp.float32) * 0.5
    img = jnp.zeros((B, 3, H_img, W_img), dtype=jnp.float32)

    boxes, landmarks = regression_transform(anchors, bbox_deltas, ldm_deltas, img)
    boxes = jax.block_until_ready(boxes)
    landmarks = jax.block_until_ready(landmarks)

    boxes_ref, landmarks_ref = regression_transform_ref(
        anchors, bbox_deltas, ldm_deltas, img)

    assert boxes.shape == (B, N, 4) and landmarks.shape == (B, N, 136)
    assert jnp.allclose(boxes, boxes_ref, rtol=1e-5, atol=1e-5)
    assert jnp.allclose(landmarks, landmarks_ref, rtol=1e-5, atol=1e-5)
    print("KERNEL_OK")
</pallas_src>

<mosaic_0001>
module attributes {stable_mosaic.version = 11 : i64} {
  func.func @_regression_transform_kernel(%arg0: i32, %arg1: i32, %arg2: memref<1x4x384xf32, #tpu.memory_space<vmem>>, %arg3: memref<1x4x384xf32, #tpu.memory_space<vmem>>, %arg4: memref<1x136x384xf32, #tpu.memory_space<vmem>>, %arg5: memref<1x4x384xf32, #tpu.memory_space<vmem>>, %arg6: memref<1x136x384xf32, #tpu.memory_space<vmem>>) attributes {dimension_semantics = [#tpu.dimension_semantics<parallel>, #tpu.dimension_semantics<parallel>], iteration_bounds = array<i64: 2, 1>, scalar_prefetch = 0 : i64, scratch_operands = 0 : i64, tpu.core_type = #tpu.core_type<tc>, window_params = [{transform_indices = @transform_0, window_bounds = array<i64: 1, 4, 384>}, {transform_indices = @transform_1, window_bounds = array<i64: 1, 4, 384>}, {transform_indices = @transform_2, window_bounds = array<i64: 1, 136, 384>}, {transform_indices = @transform_3, window_bounds = array<i64: 1, 4, 384>}, {transform_indices = @transform_4, window_bounds = array<i64: 1, 136, 384>}]} {
    %c0 = arith.constant 0 : index
    %c0_0 = arith.constant 0 : index
    %c0_1 = arith.constant 0 : index
    %0 = vector.load %arg2[%c0, %c0_0, %c0_1] : memref<1x4x384xf32, #tpu.memory_space<vmem>>, vector<1x4x384xf32>
    %1 = vector.shape_cast %0 : vector<1x4x384xf32> to vector<4x384xf32>
    %c0_2 = arith.constant 0 : index
    %c0_3 = arith.constant 0 : index
    %c0_4 = arith.constant 0 : index
    %2 = vector.load %arg3[%c0_2, %c0_3, %c0_4] : memref<1x4x384xf32, #tpu.memory_space<vmem>>, vector<1x4x384xf32>
    %3 = vector.shape_cast %2 : vector<1x4x384xf32> to vector<4x384xf32>
    %c0_5 = arith.constant 0 : index
    %c0_6 = arith.constant 0 : index
    %c0_7 = arith.constant 0 : index
    %4 = vector.load %arg4[%c0_5, %c0_6, %c0_7] : memref<1x136x384xf32, #tpu.memory_space<vmem>>, vector<1x136x384xf32>
    %5 = vector.shape_cast %4 : vector<1x136x384xf32> to vector<136x384xf32>
    %6 = vector.extract_strided_slice %1 {offsets = [0, 0], sizes = [1, 384], strides = [1, 1]} : vector<4x384xf32> to vector<1x384xf32>
    %7 = vector.extract_strided_slice %1 {offsets = [1, 0], sizes = [1, 384], strides = [1, 1]} : vector<4x384xf32> to vector<1x384xf32>
    %8 = vector.extract_strided_slice %1 {offsets = [2, 0], sizes = [1, 384], strides = [1, 1]} : vector<4x384xf32> to vector<1x384xf32>
    %9 = vector.extract_strided_slice %1 {offsets = [3, 0], sizes = [1, 384], strides = [1, 1]} : vector<4x384xf32> to vector<1x384xf32>
    %10 = arith.subf %8, %6 : vector<1x384xf32>
    %11 = arith.subf %9, %7 : vector<1x384xf32>
    %cst = arith.constant 5.000000e-01 : f32
    %12 = vector.broadcast %cst : f32 to vector<1x384xf32>
    %13 = arith.mulf %12, %10 : vector<1x384xf32>
    %14 = arith.addf %6, %13 : vector<1x384xf32>
    %cst_8 = arith.constant 5.000000e-01 : f32
    %15 = vector.broadcast %cst_8 : f32 to vector<1x384xf32>
    %16 = arith.mulf %15, %11 : vector<1x384xf32>
    %17 = arith.addf %7, %16 : vector<1x384xf32>
    %18 = vector.extract_strided_slice %3 {offsets = [0, 0], sizes = [1, 384], strides = [1, 1]} : vector<4x384xf32> to vector<1x384xf32>
    %cst_9 = arith.constant 1.000000e-01 : f32
    %19 = vector.broadcast %cst_9 : f32 to vector<1x384xf32>
    %20 = arith.mulf %18, %19 : vector<1x384xf32>
    %21 = vector.extract_strided_slice %3 {offsets = [1, 0], sizes = [1, 384], strides = [1, 1]} : vector<4x384xf32> to vector<1x384xf32>
    %cst_10 = arith.constant 1.000000e-01 : f32
    %22 = vector.broadcast %cst_10 : f32 to vector<1x384xf32>
    %23 = arith.mulf %21, %22 : vector<1x384xf32>
    %24 = vector.extract_strided_slice %3 {offsets = [2, 0], sizes = [1, 384], strides = [1, 1]} : vector<4x384xf32> to vector<1x384xf32>
    %cst_11 = arith.constant 2.000000e-01 : f32
    %25 = vector.broadcast %cst_11 : f32 to vector<1x384xf32>
    %26 = arith.mulf %24, %25 : vector<1x384xf32>
    %27 = vector.extract_strided_slice %3 {offsets = [3, 0], sizes = [1, 384], strides = [1, 1]} : vector<4x384xf32> to vector<1x384xf32>
    %cst_12 = arith.constant 2.000000e-01 : f32
    %28 = vector.broadcast %cst_12 : f32 to vector<1x384xf32>
    %29 = arith.mulf %27, %28 : vector<1x384xf32>
    %30 = arith.mulf %20, %10 : vector<1x384xf32>
    %31 = arith.addf %14, %30 : vector<1x384xf32>
    %32 = arith.mulf %23, %11 : vector<1x384xf32>
    %33 = arith.addf %17, %32 : vector<1x384xf32>
    %34 = math.exp %26 : vector<1x384xf32>
    %35 = arith.mulf %34, %10 : vector<1x384xf32>
    %36 = math.exp %29 : vector<1x384xf32>
    %37 = arith.mulf %36, %11 : vector<1x384xf32>
    %cst_13 = arith.constant 5.000000e-01 : f32
    %38 = vector.broadcast %cst_13 : f32 to vector<1x384xf32>
    %39 = arith.mulf %38, %35 : vector<1x384xf32>
    %40 = arith.subf %31, %39 : vector<1x384xf32>
    %cst_14 = arith.constant 0.000000e+00 : f32
    %cst_15 = arith.constant 6.400000e+01 : f32
    %41 = vector.broadcast %cst_14 : f32 to vector<1x384xf32>
    %42 = arith.maximumf %41, %40 : vector<1x384xf32>
    %43 = vector.broadcast %cst_15 : f32 to vector<1x384xf32>
    %44 = arith.minimumf %43, %42 : vector<1x384xf32>
    %cst_16 = arith.constant 5.000000e-01 : f32
    %45 = vector.broadcast %cst_16 : f32 to vector<1x384xf32>
    %46 = arith.mulf %45, %37 : vector<1x384xf32>
    %47 = arith.subf %33, %46 : vector<1x384xf32>
    %cst_17 = arith.constant 0.000000e+00 : f32
    %cst_18 = arith.constant 6.400000e+01 : f32
    %48 = vector.broadcast %cst_17 : f32 to vector<1x384xf32>
    %49 = arith.maximumf %48, %47 : vector<1x384xf32>
    %50 = vector.broadcast %cst_18 : f32 to vector<1x384xf32>
    %51 = arith.minimumf %50, %49 : vector<1x384xf32>
    %cst_19 = arith.constant 5.000000e-01 : f32
    %52 = vector.broadcast %cst_19 : f32 to vector<1x384xf32>
    %53 = arith.mulf %52, %35 : vector<1x384xf32>
    %54 = arith.addf %31, %53 : vector<1x384xf32>
    %cst_20 = arith.constant 0.000000e+00 : f32
    %cst_21 = arith.constant 6.400000e+01 : f32
    %55 = vector.broadcast %cst_20 : f32 to vector<1x384xf32>
    %56 = arith.maximumf %55, %54 : vector<1x384xf32>
    %57 = vector.broadcast %cst_21 : f32 to vector<1x384xf32>
    %58 = arith.minimumf %57, %56 : vector<1x384xf32>
    %cst_22 = arith.constant 5.000000e-01 : f32
    %59 = vector.broadcast %cst_22 : f32 to vector<1x384xf32>
    %60 = arith.mulf %59, %37 : vector<1x384xf32>
    %61 = arith.addf %33, %60 : vector<1x384xf32>
    %cst_23 = arith.constant 0.000000e+00 : f32
    %cst_24 = arith.constant 6.400000e+01 : f32
    %62 = vector.broadcast %cst_23 : f32 to vector<1x384xf32>
    %63 = arith.maximumf %62, %61 : vector<1x384xf32>
    %64 = vector.broadcast %cst_24 : f32 to vector<1x384xf32>
    %65 = arith.minimumf %64, %63 : vector<1x384xf32>
    %c0_25 = arith.constant 0 : index
    %c0_26 = arith.constant 0 : index
    %c0_27 = arith.constant 0 : index
    %66 = vector.load %arg5[%c0_25, %c0_26, %c0_27] : memref<1x4x384xf32, #tpu.memory_space<vmem>>, vector<1x1x384xf32>
    %67 = vector.shape_cast %66 : vector<1x1x384xf32> to vector<1x384xf32>
    %68 = vector.shape_cast %44 : vector<1x384xf32> to vector<1x1x384xf32>
    tpu.vector_store %arg5[%c0_25, %c0_26, %c0_27], %68 {strides = array<i32>} : memref<1x4x384xf32, #tpu.memory_space<vmem>>, vector<1x1x384xf32>,
    %c0_28 = arith.constant 0 : index
    %c1 = arith.constant 1 : index
    %c0_29 = arith.constant 0 : index
    %69 = vector.load %arg5[%c0_28, %c1, %c0_29] : memref<1x4x384xf32, #tpu.memory_space<vmem>>, vector<1x1x384xf32>
    %70 = vector.shape_cast %69 : vector<1x1x384xf32> to vector<1x384xf32>
    %71 = vector.shape_cast %51 : vector<1x384xf32> to vector<1x1x384xf32>
    tpu.vector_store %arg5[%c0_28, %c1, %c0_29], %71 {strides = array<i32>} : memref<1x4x384xf32, #tpu.memory_space<vmem>>, vector<1x1x384xf32>,
    %c0_30 = arith.constant 0 : index
    %c2 = arith.constant 2 : index
    %c0_31 = arith.constant 0 : index
    %72 = vector.load %arg5[%c0_30, %c2, %c0_31] : memref<1x4x384xf32, #tpu.memory_space<vmem>>, vector<1x1x384xf32>
    %73 = vector.shape_cast %72 : vector<1x1x384xf32> to vector<1x384xf32>
    %74 = vector.shape_cast %58 : vector<1x384xf32> to vector<1x1x384xf32>
    tpu.vector_store %arg5[%c0_30, %c2, %c0_31], %74 {strides = array<i32>} : memref<1x4x384xf32, #tpu.memory_space<vmem>>, vector<1x1x384xf32>,
    %c0_32 = arith.constant 0 : index
    %c3 = arith.constant 3 : index
    %c0_33 = arith.constant 0 : index
    %75 = vector.load %arg5[%c0_32, %c3, %c0_33] : memref<1x4x384xf32, #tpu.memory_space<vmem>>, vector<1x1x384xf32>
    %76 = vector.shape_cast %75 : vector<1x1x384xf32> to vector<1x384xf32>
    %77 = vector.shape_cast %65 : vector<1x384xf32> to vector<1x1x384xf32>
    tpu.vector_store %arg5[%c0_32, %c3, %c0_33], %77 {strides = array<i32>} : memref<1x4x384xf32, #tpu.memory_space<vmem>>, vector<1x1x384xf32>,
    %78 = tpu.iota {dimensions = array<i32: 0>} : vector<136x384xi32>
    %c2_i32 = arith.constant 2 : i32
    %c0_i32 = arith.constant 0 : i32
    %79 = arith.cmpi eq, %c2_i32, %c0_i32 : i32
    %c1_i32 = arith.constant 1 : i32
    %80 = arith.select %79, %c1_i32, %c2_i32 : i32
    %81 = vector.broadcast %80 : i32 to vector<136x384xi32>
    %82 = arith.remsi %78, %81 : vector<136x384xi32>
    %c0_i32_34 = arith.constant 0 : i32
    %83 = vector.broadcast %c0_i32_34 : i32 to vector<136x384xi32>
    %84 = arith.cmpi ne, %82, %83 : vector<136x384xi32>
    %c0_i32_35 = arith.constant 0 : i32
    %85 = vector.broadcast %c0_i32_35 : i32 to vector<136x384xi32>
    %86 = arith.cmpi slt, %82, %85 : vector<136x384xi32>
    %c0_i32_36 = arith.constant 0 : i32
    %87 = arith.cmpi slt, %80, %c0_i32_36 : i32
    %88 = vector.broadcast %87 : i1 to vector<136x384xi1>
    %89 = vector.broadcast %88 : vector<136x384xi1> to vector<136x384xi1>
    %90 = arith.xori %86, %89 : vector<136x384xi1>
    %91 = arith.andi %90, %84 : vector<136x384xi1>
    %92 = vector.broadcast %80 : i32 to vector<136x384xi32>
    %93 = arith.addi %82, %92 : vector<136x384xi32>
    %94 = arith.select %91, %93, %82 : vector<136x384xi1>, vector<136x384xi32>
    %c0_i32_37 = arith.constant 0 : i32
    %95 = vector.broadcast %c0_i32_37 : i32 to vector<136x384xi32>
    %96 = arith.cmpi eq, %94, %95 : vector<136x384xi32>
    %97 = vector.shape_cast %14 : vector<1x384xf32> to vector<1x384xf32>
    %98 = vector.broadcast %97 : vector<1x384xf32> to vector<136x384xf32>
    %99 = vector.shape_cast %17 : vector<1x384xf32> to vector<1x384xf32>
    %100 = vector.broadcast %99 : vector<1x384xf32> to vector<136x384xf32>
    %101 = arith.select %96, %98, %100 : vector<136x384xi1>, vector<136x384xf32>
    %102 = vector.shape_cast %10 : vector<1x384xf32> to vector<1x384xf32>
    %103 = vector.broadcast %102 : vector<1x384xf32> to vector<136x384xf32>
    %104 = vector.shape_cast %11 : vector<1x384xf32> to vector<1x384xf32>
    %105 = vector.broadcast %104 : vector<1x384xf32> to vector<136x384xf32>
    %106 = arith.select %96, %103, %105 : vector<136x384xi1>, vector<136x384xf32>
    %cst_38 = arith.constant 6.400000e+01 : f32
    %cst_39 = arith.constant 6.400000e+01 : f32
    %107 = vector.broadcast %cst_38 : f32 to vector<136x384xf32>
    %108 = vector.broadcast %cst_39 : f32 to vector<136x384xf32>
    %109 = arith.select %96, %107, %108 : vector<136x384xi1>, vector<136x384xf32>
    %cst_40 = arith.constant 1.000000e-01 : f32
    %110 = vector.broadcast %cst_40 : f32 to vector<136x384xf32>
    %111 = arith.mulf %5, %110 : vector<136x384xf32>
    %112 = arith.mulf %111, %106 : vector<136x384xf32>
    %113 = arith.addf %101, %112 : vector<136x384xf32>
    %cst_41 = arith.constant 0.000000e+00 : f32
    %114 = vector.broadcast %cst_41 : f32 to vector<136x384xf32>
    %115 = arith.maximumf %114, %113 : vector<136x384xf32>
    %116 = arith.minimumf %109, %115 : vector<136x384xf32>
    %c0_42 = arith.constant 0 : index
    %c0_43 = arith.constant 0 : index
    %c0_44 = arith.constant 0 : index
    %117 = vector.load %arg6[%c0_42, %c0_43, %c0_44] : memref<1x136x384xf32, #tpu.memory_space<vmem>>, vector<1x136x384xf32>
    %118 = vector.shape_cast %117 : vector<1x136x384xf32> to vector<136x384xf32>
    %119 = vector.shape_cast %116 : vector<136x384xf32> to vector<1x136x384xf32>
    tpu.vector_store %arg6[%c0_42, %c0_43, %c0_44], %119 {strides = array<i32>} : memref<1x136x384xf32, #tpu.memory_space<vmem>>, vector<1x136x384xf32>,
    return
  }
  func.func @transform_0(%arg0: i32, %arg1: i32) -> (i32, i32, i32) {
    %c0_i32 = arith.constant 0 : i32
    %c0_i32_0 = arith.constant 0 : i32
    return %arg0, %c0_i32, %arg1 : i32, i32, i32
  }
  func.func @transform_1(%arg0: i32, %arg1: i32) -> (i32, i32, i32) {
    %c0_i32 = arith.constant 0 : i32
    %c0_i32_0 = arith.constant 0 : i32
    return %arg0, %c0_i32, %arg1 : i32, i32, i32
  }
  func.func @transform_2(%arg0: i32, %arg1: i32) -> (i32, i32, i32) {
    %c0_i32 = arith.constant 0 : i32
    %c0_i32_0 = arith.constant 0 : i32
    return %arg0, %c0_i32, %arg1 : i32, i32, i32
  }
  func.func @transform_3(%arg0: i32, %arg1: i32) -> (i32, i32, i32) {
    %c0_i32 = arith.constant 0 : i32
    %c0_i32_0 = arith.constant 0 : i32
    return %arg0, %c0_i32, %arg1 : i32, i32, i32
  }
  func.func @transform_4(%arg0: i32, %arg1: i32) -> (i32, i32, i32) {
    %c0_i32 = arith.constant 0 : i32
    %c0_i32_0 = arith.constant 0 : i32
    return %arg0, %c0_i32, %arg1 : i32, i32, i32
  }
}

</mosaic_0001>

<bundles_post_ra>
// kernel: tpu_custom_call.1
= control target key start
LH: loop header
LB: loop body
LE: loop exit
PB: predicated region body
PF: predicated region fallthrough
CT: control target
= control target key end

     0   :  { %s2880_s0 = inlined_call_operand.hbm [shape: f32[2,4,384], index: 0, kind: input, shape index: {}]   ;;  %s2881_s1 = inlined_call_operand.hbm [shape: f32[2,4,384], index: 1, kind: input, shape index: {}]   ;;  %s2882_s2 = inlined_call_operand.hbm [shape: f32[2,136,384], index: 2, kind: input, shape index: {}]   ;;  %s2883_s3 = inlined_call_operand.hbm [shape: f32[2,4,384], index: 3, kind: output, shape index: {0}]   ;;  %s2884_s4 = inlined_call_operand.hbm [shape: f32[2,136,384], index: 4, kind: output, shape index: {1}]  }
   0x1   :  { %2893 = sst [smem:[#allocation18_spill]] %s2881_s1 }
   0x2   :  { %10 = vsyncpa [#allocation3], 0 }
   0x3   :  { %12 = vsyncpa [#allocation3 + $0x1], 0 }
   0x4   :  { %13 = vsyncpa [#allocation6], 0 }
   0x5   :  { %15 = vsyncpa [#allocation6 + $0x1], 0 }
   0x6   :  { %16 = vsyncpa [#allocation4], 0 }
   0x7   :  { %18 = vsyncpa [#allocation4 + $0x1], 0 }
   0x8   :  { %19 = vsyncpa [#allocation10], 0 }
   0x9   :  { %21 = vsyncpa [#allocation10 + $0x1], 0  ;;  %s1856_s15 = smov 0   ;;  %s1858_s16 = smov 0  }
   0xa   :  { %s1860_s17 = smov 0   ;;  %s1862_s18 = smov 0  }
   0xb   :  { %s1864_s19 = smov 0   ;;  %s1866_s20 = smov 0  }
   0xc LB: > { %2894 = sst [smem:[#allocation15_spill]] %s1807_s17  ;;  %s1887_s21 = sadd.s32 4294967295, %s1819_s20   ;;  %s1819_s20 = sphi %s1866_s20, %s27_s20   ;;  %s1815_s19 = sphi %s1864_s19, %s2956_s19   ;;  %s1811_s18 = sphi %s1862_s18, %s2955_s18   ;;  %s1807_s17 = sphi %s1860_s17, %s2951_s17   ;;  %s1803_s16 = sphi %s1858_s16, %s2954_s16   ;;  %s1799_s15 = sphi %s1856_s15, %s2953_s15  }
   0xd   : > { %s1497_s22 = sadd.s32 4294967294, %s1819_s20   ;;  %s39_s23 = sadd.s32 1, %s1815_s19 }
   0xe   : > { %s48_s24 = sadd.s32 1, %s1807_s17  ;;  %p41_p0 = scmp.ge.s32.totalorder %s39_s23, 2 }
   0xf   : > { %p55_p1 = scmp.ne.s32.totalorder %s1807_s17, %s1803_s16  ;;  %p56_p2 = scmp.eq.s32.totalorder %s1819_s20, 0 }
  0x10   : > { %p61_p3 = scmp.ne.s32.totalorder %s1803_s16, %s1799_s15  ;;  %s2958_s23 = smov (%p41_p0, %s39_s23), 0 }
  0x11   : > { %2895 = sst [smem:[#allocation16_spill]] %s2958_s23  ;;  %p1899_p4 = por %p56_p2, %p55_p1 }
  0x12   : > { %p62_p5 = scmp.eq.s32.totalorder %s1887_s21, 0  ;;  %s43_s26 = ssub.s32 %s1815_s19, %s2958_s23 }
  0x13   : > { %p143_p6 = scmp.eq.s32.totalorder %s1887_s21, 1  ;;  %p46_p7 = scmp.eq.s32.totalorder %s43_s26, 0 }
  0x14   : > { %p1907_p8 = por %p62_p5, %p61_p3  ;;  %p149_p10 = scmp.eq.s32.totalorder %s1497_s22, 1 }
  0x15   : > { %p1911_p9 = por %p143_p6, %p55_p1  ;;  %p1552_p13 = scmp.lt.s32.totalorder %s1819_s20, 2 }
  0x16   : > { %s2897_s27 = scalar_select %p1907_p8, 1, 0 }
  0x17   : > { %s2898_s28 = scalar_select %p1911_p9, 1, 0 }
  0x18   : > { %s1916_s29 = scalar_select %p46_p7, %s1807_s17, %s48_s24  }
  0x19   : > { %p1918_p11 = por %p149_p10, %p61_p3  ;;  %s1925_s5 = sand.u32 1, %s1807_s17  }
  0x1a   : > { %2899 = sst [smem:[#allocation17_spill]] %s1916_s29  ;;  %s2885_s6 = smul.u32 12, %s1925_s5 }
  0x1b   : > { %s2900_s30 = scalar_select %p1918_p11, 1, 0 }
  0x1c   : > { %s218_s7 = sand.u32 1, %s1819_s20   ;;  %s2886_s8 = smul.u32 192, %s1815_s19 }
  0x1d   : > { %p1932_p0 = pnand %p1552_p13, %p1899_p4  ;;  %s2902_s1 = sld [smem:[#allocation18_spill]] }
  0x1e   : > { %s222_s13 = scalar_lea.vmem [#allocation5], %s2885_s6  ;;  %s1519_s22 = smul.u32 408, %s1925_s5 }
  0x1f   : > { %s2901_s9 = scalar_select %p1932_p0, 1, 0 }
  0x20   : > { %s232_s14 = sshll.u32 %s222_s13, 4  ;;  %s1949_s24 = scalar_lea.sflag [#allocation6], %s218_s7  ;;  %s1946_s14 = int_to_ptr.vmem [resolvable:$true] %s232_s14 }
  0x21   : > { %p1955_p3 = pneg %p1932_p0 }
  0x23   : > { %s1941_s12 = scalar_lea.hbm %s2902_s1, %s2886_s8  ;;  %s1616_s13 = scalar_lea.hbm %s2902_s1, 384 }
  0x24   : > { %s1611_s25 = scalar_lea.hbm %s1941_s12, 192  ;;  %p1617_p6 = scmp.lt.u32.totalorder %s1941_s12, %s2902_s1 }
  0x25   : > { %p1612_p2 = scmp.ne.s32.totalorder %s1941_s12, %s1611_s25  ;;  %p1618_p7 = scmp.lt.u32.totalorder %s1616_s13, %s1611_s25 }
  0x26   : > { %p1620_p13 = scmp.lt.u32.totalorder %s1611_s25, %s1941_s12 }
  0x27   : > { %p1614_p4 = pnand %p1955_p3, %p1612_p2  ;;  %p1619_p10 = por %p1618_p7, %p1617_p6 }
  0x29   : > { %p1615_p5 = pneg %p1614_p4  ;;  %p1621_p12 = por %p1620_p13, %p1619_p10 }
  0x2b   : > { %p1622_p1 = pnand %p1621_p12, %p1615_p5 }
  0x2d   : > { %1625 = shalt.err (!%p1622_p1)
}
  0x2e   : > { %s1626_s7 = scalar_lea.vmem %s1946_s14, 192  ;;  %s1821_s10 = smov [#allocation5]  }
  0x2f   : > { %p1627_p2 = scmp.ne.s32.totalorder %s1946_s14, %s1626_s7  ;;  %s1631_s11 = sshll.u32 %s1821_s10, 4  ;;  %s1632_s11 = int_to_ptr.vmem [resolvable:$false] %s1631_s11 }
  0x30   : > { %s1633_s6 = scalar_lea.vmem %s1632_s11, 384  ;;  %p1634_p9 = scmp.lt.s32.totalorder %s1946_s14, %s1632_s11 }
  0x31   : > { %p1629_p4 = pnand %p1627_p2, %p1955_p3  ;;  %p1635_p8 = scmp.lt.s32.totalorder %s1633_s6, %s1626_s7 }
  0x33   : > { %p1630_p11 = pneg %p1629_p4  ;;  %p1636_p6 = por %p1635_p8, %p1634_p9 }
  0x35   : > { %p1637_p7 = pnand %p1636_p6, %p1630_p11 }
  0x37   : > { %1640 = shalt.err (!%p1637_p7)
}
  0x38   : > { %1541 = dma.hbm_to_vmem [thread:$0]  (!%p1932_p0), %s1941_s12, 192, %s1946_s14, %s1949_s24  }
  0x39   : > { %p260_p12 = scmp.lt.s32.totalorder %s1819_s20, 3  ;;  %s243_s8 = scalar_lea.vmem [#allocation7], %s1519_s22 }
  0x3a   : > { %s252_s25 = sshll.u32 %s243_s8, 4  ;;  %p2904_p8 = scmp.ge.s32.totalorder %s1819_s20, 1  ;;  %s1982_s25 = int_to_ptr.vmem [resolvable:$true] %s252_s25 }
  0x3b   : > { %s2906_s7 = smul.u32 192, %s1815_s19  ;;  %s198_s8 = scalar_lea.sflag [#allocation3], %s1925_s5 }
  0x3c   : > { %p1986_p9 = pnand %p2904_p8, %p260_p12  ;;  %s2907_s1 = smul.u32 12, %s1925_s5 }
  0x3d   : > { %s1995_s6 = scalar_lea.hbm %s2880_s0, %s2906_s7  ;;  %s1520_s22 = smul.u32 6528, %s1815_s19 }
  0x3e   : > { %s2905_s13 = scalar_select %p1986_p9, 1, 0 }
  0x3f   : > { %s201_s12 = scalar_lea.vmem [#allocation2], %s2907_s1  ;;  %s1641_s23 = scalar_lea.hbm %s1995_s6, 192 }
  0x40   : > { %s211_s14 = sshll.u32 %s201_s12, 4  ;;  %p1642_p11 = scmp.ne.s32.totalorder %s1995_s6, %s1641_s23  ;;  %s212_s14 = int_to_ptr.vmem [resolvable:$true] %s211_s14 }
  0x41   : > { %s1646_s7 = scalar_lea.hbm %s2880_s0, 384  ;;  %p1647_p10 = scmp.lt.u32.totalorder %s1995_s6, %s2880_s0 }
  0x42   : > { %p1644_p1 = pnand %p1642_p11, %p1955_p3  ;;  %p1648_p13 = scmp.lt.u32.totalorder %s1646_s7, %s1641_s23 }
  0x43   : > { %p1650_p4 = scmp.lt.u32.totalorder %s1641_s23, %s1995_s6 }
  0x44   : > { %p1645_p5 = pneg %p1644_p1  ;;  %p1649_p2 = por %p1648_p13, %p1647_p10 }
  0x46   : > { %p1651_p6 = por %p1650_p4, %p1649_p2 }
  0x48   : > { %p1652_p7 = pnand %p1651_p6, %p1645_p5 }
  0x4a   : > { %1655 = shalt.err (!%p1652_p7)
}
  0x4b   : > { %s1656_s1 = scalar_lea.vmem %s212_s14, 192  ;;  %s1822_s5 = smov [#allocation2]  }
  0x4c   : > { %p1657_p12 = scmp.ne.s32.totalorder %s212_s14, %s1656_s1  ;;  %s1661_s12 = sshll.u32 %s1822_s5, 4  ;;  %s1662_s12 = int_to_ptr.vmem [resolvable:$false] %s1661_s12 }
  0x4d   : > { %s1663_s17 = scalar_lea.vmem %s1662_s12, 384  ;;  %p1664_p1 = scmp.lt.s32.totalorder %s212_s14, %s1662_s12 }
  0x4e   : > { %p1659_p8 = pnand %p1657_p12, %p1955_p3  ;;  %p1665_p9 = scmp.lt.s32.totalorder %s1663_s17, %s1656_s1 }
  0x50   : > { %p1660_p11 = pneg %p1659_p8  ;;  %p1666_p0 = por %p1665_p9, %p1664_p1 }
  0x52   : > { %p1667_p10 = pnand %p1666_p0, %p1660_p11 }
  0x54   : > { %1670 = shalt.err (!%p1667_p10)
}
  0x55   : > { %p2908_p13 = scmp.ne.s32.totalorder %s2901_s9, 0  ;;  %s2023_s7 = scalar_lea.hbm %s2882_s2, %s1520_s22 }
  0x56   : > { %s1671_s10 = scalar_lea.hbm %s2023_s7, 6528  ;;  %s1676_s5 = scalar_lea.hbm %s2882_s2, 13056 }
  0x57   : > { %1538 = dma.hbm_to_vmem [thread:$0]  (!%p2908_p13), %s1995_s6, 192, %s212_s14, %s198_s8  }
  0x58   : > { %p1672_p9 = scmp.ne.s32.totalorder %s2023_s7, %s1671_s10  ;;  %p1677_p2 = scmp.lt.u32.totalorder %s2023_s7, %s2882_s2 }
  0x59   : > { %p1678_p4 = scmp.lt.u32.totalorder %s1676_s5, %s1671_s10  ;;  %p1680_p7 = scmp.lt.u32.totalorder %s1671_s10, %s2023_s7 }
  0x5a   : > { %p1674_p0 = pnand %p1672_p9, %p1955_p3 }
  0x5b   : > { %p1679_p6 = por %p1678_p4, %p1677_p2 }
  0x5c   : > { %p1675_p5 = pneg %p1674_p0 }
  0x5d   : > { %p1681_p12 = por %p1680_p7, %p1679_p6 }
  0x5f   : > { %p1682_p8 = pnand %p1681_p12, %p1675_p5 }
  0x61   : > { %1685 = shalt.err (!%p1682_p8)
}
  0x62   : > { %s1686_s22 = scalar_lea.vmem %s1982_s25, 6528  ;;  %s1823_s8 = smov [#allocation7]  }
  0x63   : > { %p1687_p11 = scmp.ne.s32.totalorder %s1982_s25, %s1686_s22  ;;  %s1691_s12 = sshll.u32 %s1823_s8, 4  ;;  %s1692_s12 = int_to_ptr.vmem [resolvable:$false] %s1691_s12 }
  0x64   : > { %s1693_s17 = scalar_lea.vmem %s1692_s12, 13056  ;;  %p1694_p9 = scmp.lt.s32.totalorder %s1982_s25, %s1692_s12 }
  0x65   : > { %p1689_p1 = pnand %p1687_p11, %p1955_p3  ;;  %p1695_p0 = scmp.lt.s32.totalorder %s1693_s17, %s1686_s22 }
  0x67   : > { %p1690_p10 = pneg %p1689_p1  ;;  %p1696_p2 = por %p1695_p0, %p1694_p9 }
  0x69   : > { %p1697_p4 = pnand %p1696_p2, %p1690_p10 }
  0x6b   : > { %1700 = shalt.err (!%p1697_p4)
}
  0x6c   : > { %s1824_s23 = smov 384   ;;  %s1825_s29 = smov 24  }
  0x6d   : > { %1544 = dma.hbm_to_vmem [thread:$0]  (!%p2908_p13), %s2023_s7, 6528, %s1982_s25, %s1949_s24, %s1824_s23, %s1824_s23, %s1825_s29  }
  0x6e   : > { %p2909_p3 = scmp.ne.s32.totalorder %s2905_s13, 0 }
  0x6f   : > { %s2050_s26 = sand.u32 (!%p2909_p3), 1, %s1803_s16   ;;  %p2910_p5 = scmp.ne.s32.totalorder (!%p2909_p3), %s2897_s27, 0 }
  0x70   : > { %264 = sbr.rel (%p2909_p3) target bundleno = 285 (0x11d), region = 32  ;;  %s267_s11 = scalar_lea.sflag (!%p2909_p3), [#allocation3], %s2050_s26 }
  0x71   : > { %s2053_s10 = smul.u32 (!%p2909_p3), 12, %s2050_s26 }
  0x73   : > { %s270_s1 = scalar_lea.vmem (!%p2909_p3), [#allocation2], %s2053_s10 }
  0x77   : > { %1782 = dma.done.wait (%p2910_p5), %s267_s11, 192  }
  0x78   : > { %1784 = vsyncadd (%p2910_p5), %s267_s11, 4294967104  ;;  %s275_s9 = sand.u32 1, %s1887_s21   ;;  %s279_s25 = scalar_lea.vmem [#allocation5], %s2053_s10 }
  0x79   : > { %s276_s24 = scalar_lea.sflag [#allocation6], %s275_s9 }
  0x7a   : > { %1786 = dma.done.wait (%p2910_p5), %s276_s24, 6720  }
  0x7b   : > { %1788 = vsyncadd (%p2910_p5), %s276_s24, 4294960576  ;;  %v457_v0 = vlaneseq  ;;  %s1522_s13 = smul.u32 408, %s2050_s26  ;;  %v1826_v2 = vmov 1966171168   ;;  %v333_v13 = vld [vmem:[%s270_s1] sm:$0xff]  ;;  %v335_v15 = vld [vmem:[%s279_s25] sm:$0xff] }
  0x7c   : > { %v455_v3 = vunpack.c.l.s4 %v1826_v2  ;;  %v334_v14 = vld [vmem:[%s270_s1 + $0x8] sm:$0xf]  ;;  %v336_v19 = vld [vmem:[%s279_s25 + $0x8] sm:$0xf]  ;;  %v390_v20 = vrot.slane %v333_v13, 6  ;;  %s2272_s7 = scalar_lea.vmem [#allocation8], %s2053_s10 }
  0x7d   : > { %v2068_v1 = vshrl.u32 %v457_v0, 7  ;;  %v391_v21 = vrot.slane %v334_v14, 6  ;;  %v408_v24 = vmul.f32 0.1, %v335_v15  ;;  %v410_v25 = vmul.f32 0.2, %v335_v15 }
  0x7e   : > { %v456_v16 = vunpack.c.0.s8 %v455_v3  ;;  %v411_v26 = vmul.f32 0.2, %v336_v19  ;;  %v2096_v27 = vsub.f32 %v333_v13, %v390_v20  ;;  %v409_v29 = vmul.f32 0.1, %v336_v19  ;;  %s2102_s21 = scalar_lea.vmem [#allocation7], %s1522_s13  ;;  %s2229_s27 = scalar_lea.vmem [#allocation9], %s1522_s13 }
  0x7f   : > { %v2072_v4 = vsub.s32 0, %v2068_v1  ;;  %v778_v5 = vsub.s32 4, %v2068_v1  ;;  %v2076_v6 = vsub.s32 1, %v2068_v1  ;;  %v805_v7 = vsub.s32 5, %v2068_v1  ;;  %v337_v30 = vld [vmem:[%s2102_s21] sm:$0xff]  ;;  %v338_v48 = vld [vmem:[%s2102_s21 + $0x8] sm:$0xff] }
  0x80   : > { %v879_v8 = vsub.s32 2, %v2068_v1  ;;  %v883_v9 = vsub.s32 6, %v2068_v1  ;;  %v2082_v10 = vsub.s32 3, %v2068_v1  ;;  %v910_v11 = vsub.s32 7, %v2068_v1  ;;  %v339_v49 = vld [vmem:[%s2102_s21 + $0x10] sm:$0xff]  ;;  %s1310_s5 = sshll.u32 %s2272_s7, 4  ;;  %s2287_s5 = int_to_ptr.vmem [resolvable:$true] %s1310_s5 }
  0x81   : > { %v533_v12 = vadd.s32 8, %v2068_v1  ;;  %v553_v17 = vand.u32 1, %v2068_v1  ;;  %v2088_v18 = vadd.s32 16, %v2068_v1  ;;  %v2091_v22 = vadd.s32 24, %v2068_v1  ;;  %s1523_s6 = smul.u32 192, %s1811_s18  ;;  %s1289_s12 = scalar_lea.sflag [#allocation4], %s2050_s26 }
  0x82   : > { %v2094_v23 = vadd.s32 32, %v2068_v1  ;;  %v2098_v28 = vsub.f32 %v334_v14, %v391_v21  ;;  %v424_v32 = vmul.f32 1.442695, %v410_v25  ;;  %v426_v33 = vmul.f32 1.442695, %v411_v26  ;;  %v340_v21 = vld [vmem:[%s2102_s21 + $0x18] sm:$0xff] }
  0x83   : > { %v560_v31 = vand.u32 1, %v533_v12  ;;  %v2106_v34 = vsub.s32 %v456_v16, %v2068_v1  ;;  %vm2108_vm0 = vcmp.eq.s32.totalorder %v553_v17, 0  ;;  %v982_v36 = vmul.f32 0.1, %v337_v30  ;;  %s2302_s8 = scalar_lea.hbm %s2883_s3, %s1523_s6  ;;  %s1701_s17 = scalar_lea.vmem %s2287_s5, 192 }
  0x84   : > { %v396_v37 = vmul.f32 0.5, %v2096_v27  ;;  %v397_v38 = vmul.f32 0.5, %v2098_v28  ;;  %v1506_v39 = vrot.slane %v2096_v27, 10  ;;  %v1507_v40 = vrot.slane %v2098_v28, 10  ;;  %p1702_p13 = scmp.ne.s32.totalorder %s2287_s5, %s1701_s17  ;;  %p2921_p6 = scmp.ne.s32.totalorder %s2898_s28, 0 }
  0x85   : > { %1607 = vpow2.f32 %v424_v32  ;;  %v880_v41 = vrot.slane %v2096_v27, %v879_v8  ;;  %v884_v42 = vrot.slane %v2096_v27, %v883_v9  ;;  %v888_v43 = vrot.slane %v2098_v28, %v879_v8  ;;  %s1827_s23 = smov [#allocation8]  }
  0x86   : > { %v1504_v44 = vrot.slane %v396_v37, 10  ;;  %v1505_v45 = vrot.slane %v397_v38, 10  ;;  %v420_v46 = vmul.f32 %v1506_v39, %v408_v24  ;;  %v421_v47 = vmul.f32 %v1507_v40, %v409_v29  ;;  %v341_v40 = vld [vmem:[%s2102_s21 + $0x20] sm:$0xff]  ;;  %p1703_p7 = pnand %p1702_p13, %p2921_p6  ;;  %s1705_s29 = sshll.u32 %s1827_s23, 4  ;;  %s1706_s29 = int_to_ptr.vmem [resolvable:$false] %s1705_s29 }
  0x87   : > { %1609 = vpow2.f32 %v426_v33  ;;  %v2121_v50 = vrot.slane %v880_v41, %v879_v8  ;;  %v2123_v51 = vrot.slane %v884_v42, %v879_v8  ;;  %v2125_v52 = vrot.slane %v888_v43, %v879_v8  ;;  %s1707_s10 = scalar_lea.vmem %s1706_s29, 384  ;;  %p1708_p8 = scmp.lt.s32.totalorder %s2287_s5, %s1706_s29 }
  0x88   : > { %v406_v53 = vadd.f32 %v1504_v44, %v333_v13  ;;  %v407_v54 = vadd.f32 %v1505_v45, %v334_v14  ;;  %v907_v55 = vrot.slane %v2096_v27, %v2082_v10  ;;  %v911_v56 = vrot.slane %v2096_v27, %v910_v11  ;;  %p1704_p12 = pneg %p1703_p7  ;;  %p1709_p11 = scmp.lt.s32.totalorder %s1707_s10, %s1701_s17 }
  0x89   : > { %v915_v57 = vrot.slane %v2098_v28, %v2082_v10  ;;  %v983_v58 = vmul.f32 0.1, %v338_v48  ;;  %v984_v59 = vmul.f32 0.1, %v339_v49  ;;  %vm2132_vm1 = vcmp.eq.s32.totalorder %v560_v31, 0 }
  0x8a   : > { %v2136_v61 = vadd.f32 %v420_v46, %v406_v53  ;;  %v2138_v62 = vadd.f32 %v421_v47, %v407_v54  ;;  %v775_v63 = vrot.slane %v406_v53, %v2072_v4  ;;  %v779_v2 = vrot.slane %v406_v53, %v778_v5  ;;  %p1710_p1 = por %p1709_p11, %p1708_p8 }
  0x8b   : > { %v783_v3 = vrot.slane %v407_v54, %v2072_v4  ;;  %v802_v8 = vrot.slane %v406_v53, %v2076_v6  ;;  %v806_v9 = vrot.slane %v406_v53, %v805_v7  ;;  %v810_v11 = vrot.slane %v407_v54, %v2076_v6  ;;  %v342_v53 = vld [vmem:[%s2102_s21 + $0x28] sm:$0xff] }
  0x8c   : > { %v2147_v12 = vrot.slane %v775_v63, %v2072_v4  ;;  %v2150_v13 = vrot.slane %v779_v2, %v2072_v4  ;;  %v2153_v14 = vrot.slane %v907_v55, %v2082_v10  ;;  %v2156_v5 = vrot.slane %v911_v56, %v2082_v10  ;;  %p1711_p10 = pnand %p1710_p1, %p1704_p12 }
  0x8d   : > { %v2159_v15 = vrot.slane %v783_v3, %v2072_v4  ;;  %v2162_v16 = vrot.slane %v802_v8, %v2076_v6  ;;  %v2165_v7 = vrot.slane %v806_v9, %v2076_v6  ;;  %v2168_v17 = vrot.slane %v810_v11, %v2076_v6  ;;  %v343_v8 = vld [vmem:[%s2102_s21 + $0x30] sm:$0xff] }
  0x8e   : > { %v2171_v19 = vrot.slane %v915_v57, %v2082_v10  ;;  %v931_v20 = vsel %vm2108_vm0, %v2121_v50, %v2153_v14  ;;  %v932_v4 = vsel %vm2108_vm0, %v2123_v51, %v2156_v5  ;;  %v934_v6 = vsel %vm2132_vm1, %v2121_v50, %v2153_v14 }
  0x8f   : > { %v1608_v24 = vpop.eup %1607  ;;  %v826_v10 = vsel %vm2108_vm0, %v2147_v12, %v2162_v16  ;;  %v1033_v25 = vmul.f32 %v982_v36, %v931_v20  ;;  %v827_v26 = vsel %vm2108_vm0, %v2150_v13, %v2165_v7  ;;  %v1034_v29 = vmul.f32 %v983_v58, %v932_v4 }
  0x90   : > { %v428_v30 = vmul.f32 %v1608_v24, %v2096_v27  ;;  %v828_v31 = vsel %vm2108_vm0, %v2159_v15, %v2168_v17  ;;  %v933_v32 = vsel %vm2108_vm0, %v2125_v52, %v2171_v19  ;;  %v829_v33 = vsel %vm2132_vm1, %v2147_v12, %v2162_v16 }
  0x91   : > { %v1610_v36 = vpop.eup %1609  ;;  %v1084_v37 = vadd.f32 %v1033_v25, %v826_v10  ;;  %v1085_v38 = vadd.f32 %v1034_v29, %v827_v26  ;;  %v1035_v27 = vmul.f32 %v984_v59, %v933_v32  ;;  %v985_v39 = vmul.f32 0.1, %v340_v21 }
  0x92   : > { %v429_v41 = vmul.f32 %v1610_v36, %v2098_v28  ;;  %v430_v42 = vmul.f32 0.5, %v428_v30  ;;  %v830_v35 = vsel %vm2132_vm1, %v2150_v13, %v2165_v7  ;;  %v935_v43 = vsel %vm2132_vm1, %v2123_v51, %v2156_v5 }
  0x93   : > { %v1135_v44 = vmax.f32 %v1084_v37, 0.0  ;;  %v1136_v45 = vmax.f32 %v1085_v38, 0.0  ;;  %v1086_v46 = vadd.f32 %v1035_v27, %v828_v31  ;;  %v1036_v47 = vmul.f32 %v985_v39, %v934_v6 }
  0x94   : > { %v431_v48 = vmul.f32 0.5, %v429_v41  ;;  %v434_v49 = vrot.slane %v430_v42, 6  ;;  %v986_v28 = vmul.f32 0.1, %v341_v40  ;;  %v831_v54 = vsel %vm2132_vm1, %v2159_v15, %v2168_v17  ;;  %v344_v40 = vld [vmem:[%s2102_s21 + $0x38] sm:$0xff] }
  0x95   : > { %v1186_v55 = vmin.f32 %v1135_v44, 64.0  ;;  %v1187_v56 = vmin.f32 %v1136_v45, 64.0  ;;  %v1137_v57 = vmax.f32 %v1086_v46, 0.0  ;;  %v1087_v58 = vadd.f32 %v1036_v47, %v829_v33 }
  0x96   : > { %v435_v59 = vrot.slane %v434_v49, 4  ;;  %v436_v63 = vrot.slane %v431_v48, 6  ;;  %v1037_v2 = vmul.f32 %v986_v28, %v935_v43  ;;  %v936_v3 = vsel %vm2132_vm1, %v2125_v52, %v2171_v19  ;;  %v345_v48 = vld [vmem:[%s2102_s21 + $0x40] sm:$0xff] }
  0x97   : > { %1237 = vst [vmem:[%s2229_s27] sm:$0xff] %v1186_v55  ;;  %1238 = vst [vmem:[%s2229_s27 + $0x8] sm:$0xff] %v1187_v56  ;;  %v1188_v9 = vmin.f32 %v1137_v57, 64.0  ;;  %v1138_v11 = vmax.f32 %v1087_v58, 0.0  ;;  %v987_v20 = vmul.f32 0.1, %v342_v53  ;;  %v567_v4 = vand.u32 1, %v2088_v18 }
  0x98   : > { %v437_v21 = vrot.slane %v436_v63, 4  ;;  %v440_v6 = vsub.f32 %v2136_v61, %v435_v59  ;;  %v446_v60 = vadd.f32 %v435_v59, %v2136_v61  ;;  %v1088_v24 = vadd.f32 %v1037_v2, %v830_v35 }
  0x99   : > { %1239 = vst [vmem:[%s2229_s27 + $0x10] sm:$0xff] %v1188_v9  ;;  %v1189_v10 = vmin.f32 %v1138_v11, 64.0  ;;  %v1038_v25 = vmul.f32 %v987_v20, %v936_v3  ;;  %vm2237_vm2 = vcmp.eq.s32.totalorder %v567_v4, 0  ;;  %v988_v29 = vmul.f32 0.1, %v343_v8 }
  0x9a   : > { %v441_v30 = vsub.f32 %v2138_v62, %v437_v21  ;;  %v442_v31 = vmax.f32 %v440_v6, 0.0  ;;  %v447_v18 = vadd.f32 %v437_v21, %v2138_v62  ;;  %v448_v32 = vmax.f32 %v446_v60, 0.0  ;;  %v346_v60 = vld [vmem:[%s2102_s21 + $0x48] sm:$0xff] }
  0x9b   : > { %vm2244_vm3 = vcmp.lt.s32.totalorder %v457_v0, 384  ;;  %1240 = vst [vmem:[%s2229_s27 + $0x18] sm:$0xff] %v1189_v10  ;;  %v1139_v61 = vmax.f32 %v1088_v24, 0.0  ;;  %v1089_v36 = vadd.f32 %v1038_v25, %v831_v54  ;;  %v832_v37 = vsel %vm2237_vm2, %v2147_v12, %v2162_v16 }
  0x9c   : > { %v937_v62 = vsel %vm2237_vm2, %v2121_v50, %v2153_v14  ;;  %v443_v38 = vmax.f32 %v441_v30, 0.0  ;;  %v444_v0 = vmin.f32 %v442_v31, 64.0  ;;  %v449_v27 = vmax.f32 %v447_v18, 0.0 }
  0x9d   : > { %v450_v39 = vmin.f32 %v448_v32, 64.0  ;;  %v1190_v41 = vmin.f32 %v1139_v61, 64.0  ;;  %v1140_v42 = vmax.f32 %v1089_v36, 0.0  ;;  %v1039_v35 = vmul.f32 %v988_v29, %v937_v62  ;;  %v348_v32 = vld [vmem:[%s2102_s21 + $0x58] sm:$0xff] }
  0x9e   : > { %v833_v43 = vsel %vm2237_vm2, %v2150_v13, %v2165_v7  ;;  %v445_v44 = vmin.f32 %v443_v38, 64.0  ;;  %v460_v45 = vrot.slane %v444_v0, %v2106_v34  ;;  %v451_v46 = vmin.f32 %v449_v27, 64.0  ;;  %v349_v38 = vld [vmem:[%s2102_s21 + $0x60] sm:$0xff]  ;;  %v350_v0 = vld [vmem:[%s2102_s21 + $0x68] sm:$0xff] }
  0x9f   : > { %v501_v47 = vrot.slane %v450_v39, %v2106_v34  ;;  %1241 = vst [vmem:[%s2229_s27 + $0x20] sm:$0xff] %v1190_v41  ;;  %v1191_v49 = vmin.f32 %v1140_v42, 64.0  ;;  %v1090_v28 = vadd.f32 %v1039_v35, %v832_v37  ;;  %v938_v53 = vsel %vm2237_vm2, %v2123_v51, %v2156_v5 }
  0xa0   : > { %v989_v54 = vmul.f32 0.1, %v344_v40  ;;  %v467_v55 = vrot.slane %v445_v44, %v2106_v34  ;;  %v508_v56 = vrot.slane %v451_v46, %v2106_v34  ;;  %v834_v57 = vsel %vm2237_vm2, %v2159_v15, %v2168_v17 }
  0xa1   : > { %v939_v58 = vsel %vm2237_vm2, %v2125_v52, %v2171_v19  ;;  %1242 = vst [vmem:[%s2229_s27 + $0x28] sm:$0xff] %v1191_v49  ;;  %v1141_v59 = vmax.f32 %v1090_v28, 0.0  ;;  %v990_v2 = vmul.f32 0.1, %v345_v48  ;;  %v574_v3 = vand.u32 1, %v2091_v22  ;;  %v347_v22 = vld [vmem:[%s2102_s21 + $0x50] sm:$0xff] }
  0xa2   : > { %v1040_v63 = vmul.f32 %v989_v54, %v938_v53  ;;  %v468_v8 = vcombine.low %v460_v45, %v467_v55  ;;  %v482_v9 = vcombine.high %v460_v45, %v467_v55  ;;  %v509_v11 = vcombine.low %v501_v47, %v508_v56 }
  0xa3   : > { %v520_v20 = vcombine.high %v501_v47, %v508_v56  ;;  %v1192_v4 = vmin.f32 %v1141_v59, 64.0  ;;  %v1041_v6 = vmul.f32 %v990_v2, %v939_v58  ;;  %vm2290_vm4 = vcmp.eq.s32.totalorder %v574_v3, 0 }
  0xa4   : > { %v1091_v21 = vadd.f32 %v1040_v63, %v833_v43  ;;  %v475_v10 = vrot.slane %v468_v8, %v2106_v34  ;;  %v489_v25 = vrot.slane %v482_v9, %v2106_v34  ;;  %v516_v26 = vrot.slane %v509_v11, %v2106_v34 }
  0xa5   : > { %v527_v29 = vrot.slane %v520_v20, %v2106_v34  ;;  %1243 = vst [vmem:[%s2229_s27 + $0x30] sm:$0xff] %v1192_v4  ;;  %v1092_v31 = vadd.f32 %v1041_v6, %v834_v57  ;;  %v835_v18 = vsel %vm2290_vm4, %v2147_v12, %v2162_v16  ;;  %v940_v34 = vsel %vm2290_vm4, %v2121_v50, %v2153_v14 }
  0xa6   : > { %v1142_v30 = vmax.f32 %v1091_v21, 0.0  ;;  %481 = vst.msk [vmem:[%s2272_s7] ss:$4 sm:$0x7] %vm2244_vm3, %v475_v10  ;;  %v991_v61 = vmul.f32 0.1, %v346_v60  ;;  %v836_v36 = vsel %vm2290_vm4, %v2150_v13, %v2165_v7  ;;  %v941_v37 = vsel %vm2290_vm4, %v2123_v51, %v2156_v5 }
  0xa7   : > { %1508 = vst.msk [vmem:[%s2272_s7 + $0x1] ss:$4 sm:$0x7] %vm2244_vm3, %v489_v25  ;;  %1509 = vst.msk [vmem:[%s2272_s7 + $0x2] ss:$4 sm:$0x7] %vm2244_vm3, %v516_v26  ;;  %v837_v33 = vsel %vm2290_vm4, %v2159_v15, %v2168_v17  ;;  %v942_v40 = vsel %vm2290_vm4, %v2125_v52, %v2171_v19 }
  0xa8   : > { %1510 = vst.msk [vmem:[%s2272_s7 + $0x3] ss:$4 sm:$0x7] %vm2244_vm3, %v527_v29  ;;  %v992_v62 = vmul.f32 0.1, %v347_v22  ;;  %v1193_v27 = vmin.f32 %v1142_v30, 64.0 }
  0xa9   : > { %v1143_v39 = vmax.f32 %v1092_v31, 0.0 }
  0xaa   : > { %1714 = shalt.err (!%p1711_p10)
}
  0xab   : > { %s1715_s11 = scalar_lea.hbm %s2302_s8, 192  ;;  %s1719_s24 = scalar_lea.hbm %s2883_s3, 384 }
  0xac   : > { %p1716_p9 = scmp.ne.s32.totalorder %s2302_s8, %s1715_s11  ;;  %p1720_p4 = scmp.lt.u32.totalorder %s2302_s8, %s2883_s3 }
  0xad   : > { %p1721_p3 = scmp.lt.u32.totalorder %s1719_s24, %s1715_s11  ;;  %p1723_p13 = scmp.lt.u32.totalorder %s1715_s11, %s2302_s8 }
  0xae   : > { %p1717_p0 = pnand %p1716_p9, %p2921_p6 }
  0xaf   : > { %p1722_p5 = por %p1721_p3, %p1720_p4 }
  0xb0   : > { %p1718_p2 = pneg %p1717_p0 }
  0xb1   : > { %p1724_p7 = por %p1723_p13, %p1722_p5 }
  0xb3   : > { %p1725_p12 = pnand %p1724_p7, %p1718_p2 }
  0xb5   : > { %1728 = shalt.err (!%p1725_p12)
}
  0xb6   : > { %1531 = dma.vmem_to_hbm [thread:$0]  (%p2921_p6), %s2287_s5, 192, %s2302_s8, %s1289_s12   ;;  %v1042_v41 = vmul.f32 %v991_v61, %v940_v34  ;;  %v1043_v42 = vmul.f32 %v992_v62, %v941_v37  ;;  %v993_v35 = vmul.f32 0.1, %v348_v32  ;;  %v581_v43 = vand.u32 1, %v2094_v23  ;;  %1244 = vst [vmem:[%s2229_s27 + $0x38] sm:$0xff] %v1193_v27  ;;  %v351_v54 = vld [vmem:[%s2102_s21 + $0x70] sm:$0xff] }
  0xb7   : > { %v1194_v44 = vmin.f32 %v1143_v39, 64.0  ;;  %v994_v45 = vmul.f32 0.1, %v349_v38  ;;  %v995_v46 = vmul.f32 0.1, %v350_v0  ;;  %v537_v47 = vadd.s32 40, %v2068_v1 }
  0xb8   : > { %v1093_v48 = vadd.f32 %v1042_v41, %v835_v18  ;;  %v1094_v49 = vadd.f32 %v1043_v42, %v836_v36  ;;  %v1044_v28 = vmul.f32 %v993_v35, %v942_v40  ;;  %vm2369_vm5 = vcmp.eq.s32.totalorder %v581_v43, 0  ;;  %v352_v3 = vld [vmem:[%s2102_s21 + $0x78] sm:$0xff]  ;;  %v353_v4 = vld [vmem:[%s2102_s21 + $0x80] sm:$0xff]  ;;  %v354_v21 = vld [vmem:[%s2102_s21 + $0x88] sm:$0xff]  ;;  %s1325_s7 = sshll.u32 %s2229_s27, 4  ;;  %s1828_s8 = smov [#allocation9]   ;;  %s2829_s7 = int_to_ptr.vmem [resolvable:$true] %s1325_s7 }
  0xb9   : > { %1245 = vst [vmem:[%s2229_s27 + $0x40] sm:$0xff] %v1194_v44  ;;  %v838_v23 = vsel %vm2369_vm5, %v2147_v12, %v2162_v16  ;;  %v943_v55 = vsel %vm2369_vm5, %v2121_v50, %v2153_v14  ;;  %v839_v56 = vsel %vm2369_vm5, %v2150_v13, %v2165_v7  ;;  %v944_v57 = vsel %vm2369_vm5, %v2123_v51, %v2156_v5  ;;  %v355_v39 = vld [vmem:[%s2102_s21 + $0x90] sm:$0xff]  ;;  %v356_v35 = vld [vmem:[%s2102_s21 + $0x98] sm:$0xff]  ;;  %v357_v43 = vld [vmem:[%s2102_s21 + $0xa0] sm:$0xff]  ;;  %s1729_s22 = scalar_lea.vmem %s2829_s7, 6528  ;;  %s1733_s12 = sshll.u32 %s1828_s8, 4  ;;  %s1734_s12 = int_to_ptr.vmem [resolvable:$false] %s1733_s12 }
  0xba   : > { %v1144_v58 = vmax.f32 %v1093_v48, 0.0  ;;  %v1145_v59 = vmax.f32 %v1094_v49, 0.0  ;;  %v1095_v63 = vadd.f32 %v1044_v28, %v837_v33  ;;  %v1045_v2 = vmul.f32 %v994_v45, %v943_v55  ;;  %p1730_p8 = scmp.ne.s32.totalorder %s2829_s7, %s1729_s22  ;;  %s1735_s17 = scalar_lea.vmem %s1734_s12, 13056 }
  0xbb   : > { %v1046_v8 = vmul.f32 %v995_v46, %v944_v57  ;;  %v840_v9 = vsel %vm2369_vm5, %v2159_v15, %v2168_v17  ;;  %v945_v11 = vsel %vm2369_vm5, %v2125_v52, %v2171_v19  ;;  %v996_v20 = vmul.f32 0.1, %v351_v54  ;;  %p1736_p10 = scmp.lt.s32.totalorder %s2829_s7, %s1734_s12  ;;  %p1737_p9 = scmp.lt.s32.totalorder %s1735_s17, %s1729_s22 }
  0xbc   : > { %v1195_v6 = vmin.f32 %v1144_v58, 64.0  ;;  %v1196_v60 = vmin.f32 %v1145_v59, 64.0  ;;  %v1146_v24 = vmax.f32 %v1095_v63, 0.0  ;;  %v1096_v22 = vadd.f32 %v1045_v2, %v838_v23  ;;  %p1731_p11 = pnand %p1730_p8, %p2921_p6 }
  0xbd   : > { %v1097_v10 = vadd.f32 %v1046_v8, %v839_v56  ;;  %v1047_v25 = vmul.f32 %v996_v20, %v945_v11  ;;  %v588_v26 = vand.u32 1, %v537_v47  ;;  %v997_v29 = vmul.f32 0.1, %v352_v3  ;;  %p1738_p0 = por %p1737_p9, %p1736_p10 }
  0xbe   : > { %1246 = vst [vmem:[%s2229_s27 + $0x48] sm:$0xff] %v1195_v6  ;;  %1247 = vst [vmem:[%s2229_s27 + $0x50] sm:$0xff] %v1196_v60  ;;  %v1197_v30 = vmin.f32 %v1146_v24, 64.0  ;;  %v1147_v31 = vmax.f32 %v1096_v22, 0.0  ;;  %v998_v18 = vmul.f32 0.1, %v353_v4  ;;  %p1732_p1 = pneg %p1731_p11 }
  0xbf   : > { %v999_v34 = vmul.f32 0.1, %v354_v21  ;;  %v1148_v32 = vmax.f32 %v1097_v10, 0.0  ;;  %v1098_v61 = vadd.f32 %v1047_v25, %v840_v9  ;;  %vm2404_vm6 = vcmp.eq.s32.totalorder %v588_v26, 0  ;;  %v358_v6 = vld [vmem:[%s2102_s21 + $0xa8] sm:$0xff]  ;;  %v359_v25 = vld [vmem:[%s2102_s21 + $0xb0] sm:$0xff] }
  0xc0   : > { %v538_v37 = vadd.s32 48, %v2068_v1  ;;  %1248 = vst [vmem:[%s2229_s27 + $0x58] sm:$0xff] %v1197_v30  ;;  %v1198_v62 = vmin.f32 %v1147_v31, 64.0  ;;  %v841_v38 = vsel %vm2404_vm6, %v2147_v12, %v2162_v16  ;;  %v946_v0 = vsel %vm2404_vm6, %v2121_v50, %v2153_v14  ;;  %v360_v31 = vld [vmem:[%s2102_s21 + $0xb8] sm:$0xff]  ;;  %p1739_p2 = pnand %p1738_p0, %p1732_p1 }
  0xc1   : > { %v842_v27 = vsel %vm2404_vm6, %v2150_v13, %v2165_v7  ;;  %v1199_v33 = vmin.f32 %v1148_v32, 64.0  ;;  %v1149_v40 = vmax.f32 %v1098_v61, 0.0  ;;  %v1048_v41 = vmul.f32 %v997_v29, %v946_v0 }
  0xc2   : > { %v947_v42 = vsel %vm2404_vm6, %v2123_v51, %v2156_v5  ;;  %1249 = vst [vmem:[%s2229_s27 + $0x60] sm:$0xff] %v1198_v62  ;;  %v843_v45 = vsel %vm2404_vm6, %v2159_v15, %v2168_v17  ;;  %v948_v46 = vsel %vm2404_vm6, %v2125_v52, %v2171_v19  ;;  %v595_v47 = vand.u32 1, %v538_v37 }
  0xc3   : > { %v1049_v44 = vmul.f32 %v998_v18, %v947_v42  ;;  %1250 = vst [vmem:[%s2229_s27 + $0x68] sm:$0xff] %v1199_v33  ;;  %v1200_v48 = vmin.f32 %v1149_v40, 64.0  ;;  %v1099_v49 = vadd.f32 %v1048_v41, %v841_v38  ;;  %v1050_v28 = vmul.f32 %v999_v34, %v948_v46  ;;  %v361_v18 = vld [vmem:[%s2102_s21 + $0xc0] sm:$0xff] }
  0xc4   : > { %v1000_v53 = vmul.f32 0.1, %v355_v39  ;;  %vm2439_vm7 = vcmp.eq.s32.totalorder %v595_v47, 0  ;;  %v1001_v55 = vmul.f32 0.1, %v356_v35  ;;  %v539_v10 = vadd.s32 56, %v2068_v1 }
  0xc5   : > { %v1100_v54 = vadd.f32 %v1049_v44, %v842_v27  ;;  %v1002_v56 = vmul.f32 0.1, %v357_v43  ;;  %1251 = vst [vmem:[%s2229_s27 + $0x70] sm:$0xff] %v1200_v48  ;;  %v1150_v57 = vmax.f32 %v1099_v49, 0.0  ;;  %v1101_v58 = vadd.f32 %v1050_v28, %v843_v45  ;;  %v362_v43 = vld [vmem:[%s2102_s21 + $0xc8] sm:$0xff]  ;;  %v363_v44 = vld [vmem:[%s2102_s21 + $0xd0] sm:$0xff] }
  0xc6   : > { %v844_v59 = vsel %vm2439_vm7, %v2147_v12, %v2162_v16  ;;  %v949_v63 = vsel %vm2439_vm7, %v2121_v50, %v2153_v14  ;;  %v845_v8 = vsel %vm2439_vm7, %v2150_v13, %v2165_v7  ;;  %v950_v9 = vsel %vm2439_vm7, %v2123_v51, %v2156_v5  ;;  %v364_v49 = vld [vmem:[%s2102_s21 + $0xd8] sm:$0xff]  ;;  %v367_v27 = vld [vmem:[%s2102_s21 + $0xf0] sm:$0xff] }
  0xc7   : > { %v1151_v2 = vmax.f32 %v1100_v54, 0.0  ;;  %v1051_v3 = vmul.f32 %v1000_v53, %v949_v63  ;;  %v1201_v11 = vmin.f32 %v1150_v57, 64.0  ;;  %v1152_v20 = vmax.f32 %v1101_v58, 0.0 }
  0xc8   : > { %v1052_v4 = vmul.f32 %v1001_v55, %v950_v9  ;;  %v846_v21 = vsel %vm2439_vm7, %v2159_v15, %v2168_v17  ;;  %v951_v22 = vsel %vm2439_vm7, %v2125_v52, %v2171_v19  ;;  %v602_v32 = vand.u32 1, %v539_v10 }
  0xc9   : > { %v1202_v60 = vmin.f32 %v1151_v2, 64.0  ;;  %v1102_v24 = vadd.f32 %v1051_v3, %v844_v59  ;;  %1252 = vst [vmem:[%s2229_s27 + $0x78] sm:$0xff] %v1201_v11  ;;  %v1203_v26 = vmin.f32 %v1152_v20, 64.0  ;;  %v1053_v30 = vmul.f32 %v1002_v56, %v951_v22 }
  0xca   : > { %v1103_v29 = vadd.f32 %v1052_v4, %v845_v8  ;;  %v1003_v61 = vmul.f32 0.1, %v358_v6  ;;  %v1004_v62 = vmul.f32 0.1, %v359_v25  ;;  %v540_v38 = vadd.s32 64, %v2068_v1 }
  0xcb   : > { %1253 = vst [vmem:[%s2229_s27 + $0x80] sm:$0xff] %v1202_v60  ;;  %v1153_v34 = vmax.f32 %v1102_v24, 0.0  ;;  %1254 = vst [vmem:[%s2229_s27 + $0x88] sm:$0xff] %v1203_v26  ;;  %v1104_v37 = vadd.f32 %v1053_v30, %v846_v21  ;;  %vm2477_vm8 = vcmp.eq.s32.totalorder %v602_v32, 0  ;;  %v1005_v39 = vmul.f32 0.1, %v360_v31 }
  0xcc   : > { %v1154_v36 = vmax.f32 %v1103_v29, 0.0  ;;  %v1006_v33 = vmul.f32 0.1, %v361_v18  ;;  %v847_v42 = vsel %vm2477_vm8, %v2147_v12, %v2162_v16  ;;  %v952_v35 = vsel %vm2477_vm8, %v2121_v50, %v2153_v14  ;;  %v365_v24 = vld [vmem:[%s2102_s21 + $0xe0] sm:$0xff]  ;;  %v366_v29 = vld [vmem:[%s2102_s21 + $0xe8] sm:$0xff] }
  0xcd   : > { %v1204_v0 = vmin.f32 %v1153_v34, 64.0  ;;  %v1155_v41 = vmax.f32 %v1104_v37, 0.0  ;;  %v1054_v45 = vmul.f32 %v1003_v61, %v952_v35  ;;  %v848_v46 = vsel %vm2477_vm8, %v2150_v13, %v2165_v7 }
  0xce   : > { %v1205_v40 = vmin.f32 %v1154_v36, 64.0  ;;  %v953_v47 = vsel %vm2477_vm8, %v2123_v51, %v2156_v5  ;;  %v849_v48 = vsel %vm2477_vm8, %v2159_v15, %v2168_v17  ;;  %v954_v54 = vsel %vm2477_vm8, %v2125_v52, %v2171_v19 }
  0xcf   : > { %1255 = vst [vmem:[%s2229_s27 + $0x90] sm:$0xff] %v1204_v0  ;;  %v1206_v28 = vmin.f32 %v1155_v41, 64.0  ;;  %v1055_v53 = vmul.f32 %v1004_v62, %v953_v47  ;;  %v609_v23 = vand.u32 1, %v540_v38  ;;  %v1105_v55 = vadd.f32 %v1054_v45, %v847_v42 }
  0xd0   : > { %1256 = vst [vmem:[%s2229_s27 + $0x98] sm:$0xff] %v1205_v40  ;;  %v1056_v56 = vmul.f32 %v1005_v39, %v954_v54  ;;  %v1007_v57 = vmul.f32 0.1, %v362_v43  ;;  %v1008_v58 = vmul.f32 0.1, %v363_v44  ;;  %v541_v2 = vadd.s32 72, %v2068_v1 }
  0xd1   : > { %1257 = vst [vmem:[%s2229_s27 + $0xa0] sm:$0xff] %v1206_v28  ;;  %v1106_v59 = vadd.f32 %v1055_v53, %v848_v46  ;;  %vm2511_vm9 = vcmp.eq.s32.totalorder %v609_v23, 0  ;;  %v1009_v3 = vmul.f32 0.1, %v364_v49  ;;  %v1156_v8 = vmax.f32 %v1105_v55, 0.0  ;;  %v368_v46 = vld [vmem:[%s2102_s21 + $0xf8] sm:$0xff] }
  0xd2   : > { %v1107_v9 = vadd.f32 %v1056_v56, %v849_v48  ;;  %v850_v11 = vsel %vm2511_vm9, %v2147_v12, %v2162_v16  ;;  %v955_v20 = vsel %vm2511_vm9, %v2121_v50, %v2153_v14  ;;  %v851_v6 = vsel %vm2511_vm9, %v2150_v13, %v2165_v7  ;;  %v369_v53 = vld [vmem:[%s2102_s21 + $0x100] sm:$0xff] }
  0xd3   : > { %v1157_v4 = vmax.f32 %v1106_v59, 0.0  ;;  %v1057_v21 = vmul.f32 %v1006_v33, %v955_v20  ;;  %v956_v60 = vsel %vm2511_vm9, %v2123_v51, %v2156_v5  ;;  %v1207_v22 = vmin.f32 %v1156_v8, 64.0 }
  0xd4   : > { %v1158_v10 = vmax.f32 %v1107_v9, 0.0  ;;  %v1058_v25 = vmul.f32 %v1007_v57, %v956_v60  ;;  %v852_v26 = vsel %vm2511_vm9, %v2159_v15, %v2168_v17  ;;  %v957_v18 = vsel %vm2511_vm9, %v2125_v52, %v2171_v19  ;;  %v370_v9 = vld [vmem:[%s2102_s21 + $0x108] sm:$0xff] }
  0xd5   : > { %v1208_v30 = vmin.f32 %v1157_v4, 64.0  ;;  %v1108_v31 = vadd.f32 %v1057_v21, %v850_v11  ;;  %v616_v34 = vand.u32 1, %v541_v2  ;;  %1258 = vst [vmem:[%s2229_s27 + $0xa8] sm:$0xff] %v1207_v22  ;;  %v1059_v36 = vmul.f32 %v1008_v58, %v957_v18  ;;  %v372_v18 = vld [vmem:[%s2102_s21 + $0x118] sm:$0xff] }
  0xd6   : > { %v1209_v32 = vmin.f32 %v1158_v10, 64.0  ;;  %v1109_v61 = vadd.f32 %v1058_v25, %v851_v6  ;;  %v1010_v37 = vmul.f32 0.1, %v365_v24  ;;  %v1011_v0 = vmul.f32 0.1, %v366_v29  ;;  %v371_v25 = vld [vmem:[%s2102_s21 + $0x110] sm:$0xff] }
  0xd7   : > { %1259 = vst [vmem:[%s2229_s27 + $0xb0] sm:$0xff] %v1208_v30  ;;  %v1159_v62 = vmax.f32 %v1108_v31, 0.0  ;;  %vm2544_vm10 = vcmp.eq.s32.totalorder %v616_v34, 0  ;;  %v542_v39 = vadd.s32 80, %v2068_v1  ;;  %v1110_v40 = vadd.f32 %v1059_v36, %v852_v26 }
  0xd8   : > { %1260 = vst [vmem:[%s2229_s27 + $0xb8] sm:$0xff] %v1209_v32  ;;  %v1160_v33 = vmax.f32 %v1109_v61, 0.0  ;;  %v853_v41 = vsel %vm2544_vm10, %v2147_v12, %v2162_v16  ;;  %v958_v42 = vsel %vm2544_vm10, %v2121_v50, %v2153_v14  ;;  %v854_v44 = vsel %vm2544_vm10, %v2150_v13, %v2165_v7 }
  0xd9   : > { %v1210_v35 = vmin.f32 %v1159_v62, 64.0  ;;  %v1060_v43 = vmul.f32 %v1009_v3, %v958_v42  ;;  %v959_v45 = vsel %vm2544_vm10, %v2123_v51, %v2156_v5  ;;  %v1161_v48 = vmax.f32 %v1110_v40, 0.0  ;;  %v373_v40 = vld [vmem:[%s2102_s21 + $0x120] sm:$0xff] }
  0xda   : > { %v1211_v47 = vmin.f32 %v1160_v33, 64.0  ;;  %v1061_v49 = vmul.f32 %v1010_v37, %v959_v45  ;;  %v1012_v28 = vmul.f32 0.1, %v367_v27  ;;  %v855_v23 = vsel %vm2544_vm10, %v2159_v15, %v2168_v17 }
  0xdb   : > { %1261 = vst [vmem:[%s2229_s27 + $0xc0] sm:$0xff] %v1210_v35  ;;  %v1111_v54 = vadd.f32 %v1060_v43, %v853_v41  ;;  %v960_v55 = vsel %vm2544_vm10, %v2125_v52, %v2171_v19  ;;  %v623_v56 = vand.u32 1, %v542_v39  ;;  %v1212_v57 = vmin.f32 %v1161_v48, 64.0 }
  0xdc   : > { %1262 = vst [vmem:[%s2229_s27 + $0xc8] sm:$0xff] %v1211_v47  ;;  %v1112_v58 = vadd.f32 %v1061_v49, %v854_v44  ;;  %v1062_v59 = vmul.f32 %v1011_v0, %v960_v55  ;;  %v1013_v63 = vmul.f32 0.1, %v368_v46  ;;  %v1014_v8 = vmul.f32 0.1, %v369_v53  ;;  %v374_v49 = vld [vmem:[%s2102_s21 + $0x128] sm:$0xff] }
  0xdd   : > { %v1162_v2 = vmax.f32 %v1111_v54, 0.0  ;;  %vm2579_vm11 = vcmp.eq.s32.totalorder %v623_v56, 0  ;;  %v543_v11 = vadd.s32 88, %v2068_v1  ;;  %1263 = vst [vmem:[%s2229_s27 + $0xd0] sm:$0xff] %v1212_v57  ;;  %v1015_v31 = vmul.f32 0.1, %v370_v9 }
  0xde   : > { %v1163_v20 = vmax.f32 %v1112_v58, 0.0  ;;  %v1113_v4 = vadd.f32 %v1062_v59, %v855_v23  ;;  %v856_v21 = vsel %vm2579_vm11, %v2147_v12, %v2162_v16  ;;  %v961_v6 = vsel %vm2579_vm11, %v2121_v50, %v2153_v14  ;;  %v375_v55 = vld [vmem:[%s2102_s21 + $0x130] sm:$0xff] }
  0xdf   : > { %v1213_v60 = vmin.f32 %v1162_v2, 64.0  ;;  %v1063_v24 = vmul.f32 %v1012_v28, %v961_v6  ;;  %v857_v22 = vsel %vm2579_vm11, %v2150_v13, %v2165_v7  ;;  %v962_v10 = vsel %vm2579_vm11, %v2123_v51, %v2156_v5 }
  0xe0   : > { %v1214_v26 = vmin.f32 %v1163_v20, 64.0  ;;  %v1164_v29 = vmax.f32 %v1113_v4, 0.0  ;;  %v1064_v30 = vmul.f32 %v1013_v63, %v962_v10  ;;  %v858_v32 = vsel %vm2579_vm11, %v2159_v15, %v2168_v17  ;;  %v376_v4 = vld [vmem:[%s2102_s21 + $0x138] sm:$0xff] }
  0xe1   : > { %1264 = vst [vmem:[%s2229_s27 + $0xd8] sm:$0xff] %v1213_v60  ;;  %v1114_v34 = vadd.f32 %v1063_v24, %v856_v21  ;;  %v963_v61 = vsel %vm2579_vm11, %v2125_v52, %v2171_v19  ;;  %v630_v36 = vand.u32 1, %v543_v11  ;;  %v1016_v0 = vmul.f32 0.1, %v371_v25 }
  0xe2   : > { %1265 = vst [vmem:[%s2229_s27 + $0xe0] sm:$0xff] %v1214_v26  ;;  %v1215_v37 = vmin.f32 %v1164_v29, 64.0  ;;  %v1115_v62 = vadd.f32 %v1064_v30, %v857_v22  ;;  %v1065_v38 = vmul.f32 %v1014_v8, %v963_v61  ;;  %v1017_v33 = vmul.f32 0.1, %v372_v18  ;;  %v377_v30 = vld [vmem:[%s2102_s21 + $0x140] sm:$0xff]  ;;  %v378_v61 = vld [vmem:[%s2102_s21 + $0x148] sm:$0xff] }
  0xe3   : > { %v1165_v27 = vmax.f32 %v1114_v34, 0.0  ;;  %vm2614_vm12 = vcmp.eq.s32.totalorder %v630_v36, 0  ;;  %v544_v41 = vadd.s32 96, %v2068_v1  ;;  %v1018_v23 = vmul.f32 0.1, %v373_v40 }
  0xe4   : > { %1266 = vst [vmem:[%s2229_s27 + $0xe8] sm:$0xff] %v1215_v37  ;;  %v1166_v42 = vmax.f32 %v1115_v62, 0.0  ;;  %v1116_v35 = vadd.f32 %v1065_v38, %v858_v32  ;;  %v859_v43 = vsel %vm2614_vm12, %v2147_v12, %v2162_v16  ;;  %v964_v44 = vsel %vm2614_vm12, %v2121_v50, %v2153_v14 }
  0xe5   : > { %v1216_v45 = vmin.f32 %v1165_v27, 64.0  ;;  %v1066_v46 = vmul.f32 %v1015_v31, %v964_v44  ;;  %v860_v47 = vsel %vm2614_vm12, %v2150_v13, %v2165_v7  ;;  %v965_v48 = vsel %vm2614_vm12, %v2123_v51, %v2156_v5 }
  0xe6   : > { %v1217_v28 = vmin.f32 %v1166_v42, 64.0  ;;  %v1167_v53 = vmax.f32 %v1116_v35, 0.0  ;;  %v1067_v54 = vmul.f32 %v1016_v0, %v965_v48  ;;  %v861_v57 = vsel %vm2614_vm12, %v2159_v15, %v2168_v17  ;;  %v379_v35 = vld [vmem:[%s2102_s21 + $0x150] sm:$0xff] }
  0xe7   : > { %1267 = vst [vmem:[%s2229_s27 + $0xf0] sm:$0xff] %v1216_v45  ;;  %v1117_v56 = vadd.f32 %v1066_v46, %v859_v43  ;;  %v966_v58 = vsel %vm2614_vm12, %v2125_v52, %v2171_v19  ;;  %v637_v59 = vand.u32 1, %v544_v41  ;;  %v1019_v8 = vmul.f32 0.1, %v374_v49 }
  0xe8   : > { %1268 = vst [vmem:[%s2229_s27 + $0xf8] sm:$0xff] %v1217_v28  ;;  %v1218_v63 = vmin.f32 %v1167_v53, 64.0  ;;  %v1118_v2 = vadd.f32 %v1067_v54, %v860_v47  ;;  %v1068_v3 = vmul.f32 %v1017_v33, %v966_v58  ;;  %v1020_v20 = vmul.f32 0.1, %v375_v55  ;;  %v380_v54 = vld [vmem:[%s2102_s21 + $0x158] sm:$0xff]  ;;  %v381_v58 = vld [vmem:[%s2102_s21 + $0x160] sm:$0xff] }
  0xe9   : > { %v1168_v9 = vmax.f32 %v1117_v56, 0.0  ;;  %vm2649_vm13 = vcmp.eq.s32.totalorder %v637_v59, 0  ;;  %v545_v21 = vadd.s32 104, %v2068_v1  ;;  %v1021_v32 = vmul.f32 0.1, %v376_v4 }
  0xea   : > { %1269 = vst [vmem:[%s2229_s27 + $0x100] sm:$0xff] %v1218_v63  ;;  %v1169_v6 = vmax.f32 %v1118_v2, 0.0  ;;  %v1119_v60 = vadd.f32 %v1068_v3, %v861_v57  ;;  %v862_v24 = vsel %vm2649_vm13, %v2147_v12, %v2162_v16  ;;  %v967_v22 = vsel %vm2649_vm13, %v2121_v50, %v2153_v14 }
  0xeb   : > { %v1219_v10 = vmin.f32 %v1168_v9, 64.0  ;;  %v1069_v25 = vmul.f32 %v1018_v23, %v967_v22  ;;  %v863_v26 = vsel %vm2649_vm13, %v2150_v13, %v2165_v7  ;;  %v968_v29 = vsel %vm2649_vm13, %v2123_v51, %v2156_v5 }
  0xec   : > { %v1220_v31 = vmin.f32 %v1169_v6, 64.0  ;;  %v1170_v18 = vmax.f32 %v1119_v60, 0.0  ;;  %v1070_v34 = vmul.f32 %v1019_v8, %v968_v29  ;;  %v864_v37 = vsel %vm2649_vm13, %v2159_v15, %v2168_v17  ;;  %v382_v60 = vld [vmem:[%s2102_s21 + $0x168] sm:$0xff] }
  0xed   : > { %1270 = vst [vmem:[%s2229_s27 + $0x108] sm:$0xff] %v1219_v10  ;;  %v1120_v36 = vadd.f32 %v1069_v25, %v862_v24  ;;  %v969_v62 = vsel %vm2649_vm13, %v2125_v52, %v2171_v19  ;;  %v644_v38 = vand.u32 1, %v545_v21  ;;  %v1022_v33 = vmul.f32 0.1, %v377_v30 }
  0xee   : > { %1271 = vst [vmem:[%s2229_s27 + $0x110] sm:$0xff] %v1220_v31  ;;  %v1221_v0 = vmin.f32 %v1170_v18, 64.0  ;;  %v1121_v27 = vadd.f32 %v1070_v34, %v863_v26  ;;  %v1071_v39 = vmul.f32 %v1020_v20, %v969_v62  ;;  %v1023_v42 = vmul.f32 0.1, %v378_v61  ;;  %v383_v34 = vld [vmem:[%s2102_s21 + $0x170] sm:$0xff]  ;;  %v384_v62 = vld [vmem:[%s2102_s21 + $0x178] sm:$0xff] }
  0xef   : > { %v1171_v40 = vmax.f32 %v1120_v36, 0.0  ;;  %vm2684_vm14 = vcmp.eq.s32.totalorder %v644_v38, 0  ;;  %v546_v43 = vadd.s32 112, %v2068_v1  ;;  %v1024_v57 = vmul.f32 0.1, %v379_v35 }
  0xf0   : > { %1272 = vst [vmem:[%s2229_s27 + $0x118] sm:$0xff] %v1221_v0  ;;  %v1172_v44 = vmax.f32 %v1121_v27, 0.0  ;;  %v1122_v45 = vadd.f32 %v1071_v39, %v864_v37  ;;  %v865_v46 = vsel %vm2684_vm14, %v2147_v12, %v2162_v16  ;;  %v970_v47 = vsel %vm2684_vm14, %v2121_v50, %v2153_v14 }
  0xf1   : > { %v1222_v48 = vmin.f32 %v1171_v40, 64.0  ;;  %v1072_v49 = vmul.f32 %v1021_v32, %v970_v47  ;;  %v866_v28 = vsel %vm2684_vm14, %v2150_v13, %v2165_v7  ;;  %v971_v53 = vsel %vm2684_vm14, %v2123_v51, %v2156_v5 }
  0xf2   : > { %v1223_v23 = vmin.f32 %v1172_v44, 64.0  ;;  %v1173_v55 = vmax.f32 %v1122_v45, 0.0  ;;  %v1073_v56 = vmul.f32 %v1022_v33, %v971_v53  ;;  %v867_v63 = vsel %vm2684_vm14, %v2159_v15, %v2168_v17  ;;  %v385_v45 = vld [vmem:[%s2102_s21 + $0x180] sm:$0xff] }
  0xf3   : > { %1273 = vst [vmem:[%s2229_s27 + $0x120] sm:$0xff] %v1222_v48  ;;  %v1123_v59 = vadd.f32 %v1072_v49, %v865_v46  ;;  %v972_v2 = vsel %vm2684_vm14, %v2125_v52, %v2171_v19  ;;  %v651_v3 = vand.u32 1, %v546_v43  ;;  %v1025_v20 = vmul.f32 0.1, %v380_v54 }
  0xf4   : > { %1274 = vst [vmem:[%s2229_s27 + $0x128] sm:$0xff] %v1223_v23  ;;  %v1224_v8 = vmin.f32 %v1173_v55, 64.0  ;;  %v1124_v9 = vadd.f32 %v1073_v56, %v866_v28  ;;  %v1074_v11 = vmul.f32 %v1023_v42, %v972_v2  ;;  %v1026_v6 = vmul.f32 0.1, %v381_v58  ;;  %v386_v55 = vld [vmem:[%s2102_s21 + $0x188] sm:$0xff] }
  0xf5   : > { %v1174_v4 = vmax.f32 %v1123_v59, 0.0  ;;  %vm2719_vm15 = vcmp.eq.s32.totalorder %v651_v3, 0  ;;  %v547_v24 = vadd.s32 120, %v2068_v1  ;;  %v1027_v37 = vmul.f32 0.1, %v382_v60 }
  0xf6   : > { %1275 = vst [vmem:[%s2229_s27 + $0x130] sm:$0xff] %v1224_v8  ;;  %v1175_v22 = vmax.f32 %v1124_v9, 0.0  ;;  %v1125_v10 = vadd.f32 %v1074_v11, %v867_v63  ;;  %v868_v25 = vsel %vm2719_vm15, %v2147_v12, %v2162_v16  ;;  %v973_v26 = vsel %vm2719_vm15, %v2121_v50, %v2153_v14  ;;  %v387_v63 = vld [vmem:[%s2102_s21 + $0x190] sm:$0xff]  ;;  %s1524_s21 = smul.u32 6528, %s1811_s18  ;;  %s1294_s18 = scalar_lea.sflag [#allocation10], %s2050_s26 }
  0xf7   : > { %v1225_v29 = vmin.f32 %v1174_v4, 64.0  ;;  %v1075_v30 = vmul.f32 %v1024_v57, %v973_v26  ;;  %v869_v31 = vsel %vm2719_vm15, %v2150_v13, %v2165_v7  ;;  %v974_v18 = vsel %vm2719_vm15, %v2123_v51, %v2156_v5 }
  0xf8   : > { %v1226_v32 = vmin.f32 %v1175_v22, 64.0  ;;  %v1176_v61 = vmax.f32 %v1125_v10, 0.0  ;;  %v1076_v36 = vmul.f32 %v1025_v20, %v974_v18  ;;  %v870_v0 = vsel %vm2719_vm15, %v2159_v15, %v2168_v17  ;;  %s2827_s14 = scalar_lea.hbm %s2884_s4, %s1524_s21 }
  0xf9   : > { %1276 = vst [vmem:[%s2229_s27 + $0x138] sm:$0xff] %v1225_v29  ;;  %v1126_v38 = vadd.f32 %v1075_v30, %v868_v25  ;;  %v975_v27 = vsel %vm2719_vm15, %v2125_v52, %v2171_v19  ;;  %v658_v39 = vand.u32 1, %v547_v24  ;;  %v1028_v42 = vmul.f32 0.1, %v383_v34 }
  0xfa   : > { %1277 = vst [vmem:[%s2229_s27 + $0x140] sm:$0xff] %v1226_v32  ;;  %v1227_v33 = vmin.f32 %v1176_v61, 64.0  ;;  %v1127_v40 = vadd.f32 %v1076_v36, %v869_v31  ;;  %v1077_v41 = vmul.f32 %v1026_v6, %v975_v27  ;;  %v1029_v44 = vmul.f32 0.1, %v384_v62 }
  0xfb   : > { %v1177_v35 = vmax.f32 %v1126_v38, 0.0  ;;  %vm2754_vm0 = vcmp.eq.s32.totalorder %v658_v39, 0  ;;  %v548_v46 = vadd.s32 128, %v2068_v1  ;;  %v1030_v59 = vmul.f32 0.1, %v385_v45 }
  0xfc   : > { %1278 = vst [vmem:[%s2229_s27 + $0x148] sm:$0xff] %v1227_v33  ;;  %v1178_v47 = vmax.f32 %v1127_v40, 0.0  ;;  %v1128_v48 = vadd.f32 %v1077_v41, %v870_v0  ;;  %v871_v49 = vsel %vm2754_vm0, %v2147_v12, %v2162_v16  ;;  %v976_v28 = vsel %vm2754_vm0, %v2121_v50, %v2153_v14 }
  0xfd   : > { %v1228_v53 = vmin.f32 %v1177_v35, 64.0  ;;  %v1078_v54 = vmul.f32 %v1027_v37, %v976_v28  ;;  %v872_v1 = vsel %vm2754_vm0, %v2150_v13, %v2165_v7  ;;  %v977_v23 = vsel %vm2754_vm0, %v2123_v51, %v2156_v5 }
  0xfe   : > { %v1229_v56 = vmin.f32 %v1178_v47, 64.0  ;;  %v1179_v57 = vmax.f32 %v1128_v48, 0.0  ;;  %v1079_v58 = vmul.f32 %v1028_v42, %v977_v23  ;;  %v873_v3 = vsel %vm2754_vm0, %v2159_v15, %v2168_v17 }
  0xff   : > { %1279 = vst [vmem:[%s2229_s27 + $0x150] sm:$0xff] %v1228_v53  ;;  %v1129_v2 = vadd.f32 %v1078_v54, %v871_v49  ;;  %v978_v8 = vsel %vm2754_vm0, %v2125_v52, %v2171_v19  ;;  %v665_v9 = vand.u32 1, %v548_v46  ;;  %v1031_v21 = vmul.f32 0.1, %v386_v55 }
 0x100   : > { %1280 = vst [vmem:[%s2229_s27 + $0x158] sm:$0xff] %v1229_v56  ;;  %v1230_v11 = vmin.f32 %v1179_v57, 64.0  ;;  %v1130_v20 = vadd.f32 %v1079_v58, %v872_v1  ;;  %v1080_v4 = vmul.f32 %v1029_v44, %v978_v8  ;;  %v1032_v24 = vmul.f32 0.1, %v387_v63 }
 0x101   : > { %v1180_v6 = vmax.f32 %v1129_v2, 0.0  ;;  %vm2789_vm1 = vcmp.eq.s32.totalorder %v665_v9, 0 }
 0x102   : > { %1281 = vst [vmem:[%s2229_s27 + $0x160] sm:$0xff] %v1230_v11  ;;  %v1181_v22 = vmax.f32 %v1130_v20, 0.0  ;;  %v1131_v10 = vadd.f32 %v1080_v4, %v873_v3  ;;  %v874_v25 = vsel %vm2789_vm1, %v2147_v12, %v2162_v16  ;;  %v979_v26 = vsel %vm2789_vm1, %v2121_v50, %v2153_v14 }
 0x103   : > { %v1231_v29 = vmin.f32 %v1180_v6, 64.0  ;;  %v1081_v30 = vmul.f32 %v1030_v59, %v979_v26  ;;  %v875_v31 = vsel %vm2789_vm1, %v2150_v13, %v2165_v7  ;;  %v980_v18 = vsel %vm2789_vm1, %v2123_v51, %v2156_v5 }
 0x104   : > { %v1232_v12 = vmin.f32 %v1181_v22, 64.0  ;;  %v1182_v16 = vmax.f32 %v1131_v10, 0.0  ;;  %v1082_v34 = vmul.f32 %v1031_v21, %v980_v18  ;;  %v876_v14 = vsel %vm2789_vm1, %v2159_v15, %v2168_v17 }
 0x105   : > { %1282 = vst [vmem:[%s2229_s27 + $0x168] sm:$0xff] %v1231_v29  ;;  %v1132_v50 = vadd.f32 %v1081_v30, %v874_v25  ;;  %v981_v13 = vsel %vm2789_vm1, %v2125_v52, %v2171_v19 }
 0x106   : > { %1283 = vst [vmem:[%s2229_s27 + $0x170] sm:$0xff] %v1232_v12  ;;  %v1233_v51 = vmin.f32 %v1182_v16, 64.0  ;;  %v1133_v5 = vadd.f32 %v1082_v34, %v875_v31  ;;  %v1083_v7 = vmul.f32 %v1032_v24, %v981_v13 }
 0x107   : > { %v1183_v32 = vmax.f32 %v1132_v50, 0.0 }
 0x108   : > { %1284 = vst [vmem:[%s2229_s27 + $0x178] sm:$0xff] %v1233_v51  ;;  %v1184_v61 = vmax.f32 %v1133_v5, 0.0  ;;  %v1134_v36 = vadd.f32 %v1083_v7, %v876_v14 }
 0x109   : > { %v1234_v15 = vmin.f32 %v1183_v32, 64.0 }
 0x10a   : > { %v1235_v17 = vmin.f32 %v1184_v61, 64.0  ;;  %v1185_v37 = vmax.f32 %v1134_v36, 0.0 }
 0x10b   : > { %1285 = vst [vmem:[%s2229_s27 + $0x180] sm:$0xff] %v1234_v15 }
 0x10c   : > { %1286 = vst [vmem:[%s2229_s27 + $0x188] sm:$0xff] %v1235_v17  ;;  %v1236_v52 = vmin.f32 %v1185_v37, 64.0 }
 0x10e   : > { %1287 = vst [vmem:[%s2229_s27 + $0x190] sm:$0xff] %v1236_v52 }
 0x10f   : > { %1742 = shalt.err (!%p1739_p2)
}
 0x110   : > { %s1743_s27 = scalar_lea.hbm %s2827_s14, 6528  ;;  %s1747_s10 = scalar_lea.hbm %s2884_s4, 13056 }
 0x111   : > { %p1744_p4 = scmp.ne.s32.totalorder %s2827_s14, %s1743_s27  ;;  %p1748_p13 = scmp.lt.u32.totalorder %s2827_s14, %s2884_s4 }
 0x112   : > { %p1749_p7 = scmp.lt.u32.totalorder %s1747_s10, %s1743_s27  ;;  %p1751_p8 = scmp.lt.u32.totalorder %s1743_s27, %s2827_s14 }
 0x113   : > { %p1745_p3 = pnand %p1744_p4, %p2921_p6 }
 0x114   : > { %p1750_p12 = por %p1749_p7, %p1748_p13 }
 0x115   : > { %p1746_p5 = pneg %p1745_p3 }
 0x116   : > { %p1752_p11 = por %p1751_p8, %p1750_p12 }
 0x118   : > { %p1753_p1 = pnand %p1752_p11, %p1746_p5 }
 0x11a   : > { %1756 = shalt.err (!%p1753_p1)
}
 0x11b   : > { %s1829_s9 = smov 384   ;;  %s1830_s24 = smov 24  }
 0x11c   : > { %1532 = dma.vmem_to_hbm [thread:$0]  (%p2921_p6), %s2829_s7, 6528, %s2827_s14, %s1294_s18, %s1829_s9, %s1829_s9, %s1830_s24  }
 0x11d PF: > { %s1340_s25 = sand.u32 1, %s1799_s15   ;;  %p2948_p10 = scmp.ne.s32.totalorder %s2900_s30, 0 }
 0x11e   : > { %p2949_p9 = scmp.ge.s32.totalorder %s1819_s20, 2  ;;  %s1341_s13 = scalar_lea.sflag [#allocation4], %s1340_s25 }
 0x120   : > { %p1546_p0 = pnand %p2949_p9, %p2948_p10 }
 0x122   : > { %1790 = dma.done.wait (!%p1546_p0), %s1341_s13, 192  }
 0x123   : > { %1792 = vsyncadd (!%p1546_p0), %s1341_s13, 4294967104  ;;  %s1350_s21 = scalar_lea.sflag [#allocation10], %s1340_s25 }
 0x124   : > { %1794 = dma.done.wait (!%p1546_p0), %s1350_s21, 6528  }
 0x125   : > { %1796 = vsyncadd (!%p1546_p0), %s1350_s21, 4294960768  ;;  %s27_s20 = sadd.s32 1, %s1819_s20   ;;  %s2950_s28 = sld [smem:[#allocation15_spill]] }
 0x126   : > { %p24_p2 = scmp.ge.s32.totalorder %s27_s20, 4   ;;  %s2951_s17 = sld [smem:[#allocation17_spill]] }
 0x127   : > { %s2952_s26 = sld [smem:[#allocation16_spill]]  ;;  %s2953_s15 = smov %s1803_s16 }
 0x128   : > { %s2955_s18 = smov %s1815_s19  ;;  %26 = sbr.rel (!%p24_p2) target bundleno = 12 (0xc), region = 121 }
 0x12b   : > { %s2954_s16 = smov %s2950_s28 }
 0x12d   : > { %s2956_s19 = smov %s2952_s26 }
 0x12f   :  { %1355 = vsyncpa [#allocation3], 1 }
 0x130   :  { %1357 = vsyncpa [#allocation3 + $0x1], 1 }
 0x131   :  { %1358 = vsyncpa [#allocation6], 1 }
 0x132   :  { %1360 = vsyncpa [#allocation6 + $0x1], 1 }
 0x133   :  { %1361 = vsyncpa [#allocation4], 1 }
 0x134   :  { %1363 = vsyncpa [#allocation4 + $0x1], 1 }
 0x135   :  { %1364 = vsyncpa [#allocation10], 1 }
 0x136   :  { %1366 = vsyncpa [#allocation10 + $0x1], 1 }

</bundles_post_ra>
